<compile_context>
chip_gen: v6e
topology: v6e:2x2x1
jax: 0.10.0
libtpu: 0.0.40
codegen_flags: <defaults>
</compile_context>

<pallas_src>
import jax
import jax.numpy as jnp
from jax.experimental import pallas as pl
from jax.experimental.pallas import tpu as pltpu


_BIG = 1e10
_EPS_AREA = 1e-9
_EPS_Z = 1e-6
_Z_NEAR = 1e-4


def _round_up(x, m):
    return ((x + m - 1) // m) * m


def _raster_kernel(pxy_ref, geom_ref, iuvc_ref, iuv_ref, depth_ref):
    """One (batch, pixel-tile, face-chunk) grid step.

    pxy_ref  : VMEM (2, HWt)      pixel-center x / y for this pixel tile
    geom_ref : VMEM (1, Ft, 12)   per-face affine coeffs (pre-divided by area):
                                  [b0: A,B,C | b1: A,B,C | b2: A,B,C | z: A,B,C]
    iuvc_ref : VMEM (1, 16, Ft)   per-face IUV affine coeffs (pre-divided by area)
                                  rows 0-2 = A_iuv, 3-5 = B_iuv, 6-8 = C_iuv, rest 0
    iuv_ref  : VMEM (1, 3, HWt)   running selected IUV (background = 0)
    depth_ref: VMEM (1, 1, HWt)   running z-min (finalized to -1 for background)
    """
    fc = pl.program_id(2)

    @pl.when(fc == 0)
    def _init():
        iuv_ref[...] = jnp.zeros(iuv_ref.shape, iuv_ref.dtype)
        depth_ref[...] = jnp.full(depth_ref.shape, _BIG, depth_ref.dtype)

    px = pxy_ref[0:1, :]              # (1, HWt)
    py = pxy_ref[1:2, :]              # (1, HWt)
    geom = geom_ref[0]                # (Ft, 12)
    iuvc = iuvc_ref[0]                # (16, Ft)

    def col(j):                       # per-face coefficient column, (Ft, 1)
        return geom[:, j:j + 1]

    # screen-space barycentrics via affine edge functions (already / signed area)
    b0 = col(0) + col(1) * px + col(2) * py            # (Ft, HWt)
    b1 = col(3) + col(4) * px + col(5) * py
    b2 = col(6) + col(7) * px + col(8) * py
    inside = (b0 >= 0.0) & (b1 >= 0.0) & (b2 >= 0.0)

    # interpolated camera-space z, affine in (px, py)
    z = col(9) + col(10) * px + col(11) * py           # (Ft, HWt)
    zcand = jnp.where(inside, z, _BIG)
    chunk_zmin = jnp.min(zcand, axis=0, keepdims=True)  # (1, HWt)

    # one-hot winner inside the chunk (exact-z ties only for coplanar faces,
    # which is degenerate geometry and arbitrary in PyTorch3D as well)
    sel = ((zcand <= chunk_zmin) & inside).astype(jnp.float32)   # (Ft, HWt)

    # IUV of the chunk winner on the MXU: (16, Ft) @ (Ft, HWt) -> (16, HWt)
    coefs = jnp.dot(iuvc, sel, preferred_element_type=jnp.float32)
    chunk_iuv = coefs[0:3] + coefs[3:6] * px + coefs[6:9] * py   # (3, HWt)

    # online z-buffer merge with the running accumulators (resident out blocks)
    prev_zmin = depth_ref[0]                                     # (1, HWt)
    better = chunk_zmin < prev_zmin
    depth_ref[0] = jnp.where(better, chunk_zmin, prev_zmin)
    iuv_ref[0] = jnp.where(better, chunk_iuv, iuv_ref[0])

    @pl.when(fc == pl.num_programs(2) - 1)
    def _finalize():
        zmin = depth_ref[0]
        depth_ref[0] = jnp.where(zmin >= 0.5 * _BIG, -1.0, zmin)


def textured_iuv_render(vertices, verts_map, verts_iuv, faces,
                        cam_R, cam_t, focal_length, principal_point, img_hw,
                        *, f_tile=256, hw_tile=1024):
    """JAX/Pallas equivalent of TexturedIUVRenderer.forward (render_rgb=False).

    vertices : (B, N, 3)  f32
    verts_map: (Vdp,)     int   DensePose vertex -> mesh vertex
    verts_iuv: (B, Vdp, 3) f32  per-vertex (I, U, V) features
    faces    : (F, 3)     int   DensePose faces (shared across the batch)
    returns  : {'iuv_images': (B,H,W,3) f32, 'depth_images': (B,H,W) f32}
    """
    B = vertices.shape[0]
    H, W = img_hw
    HW = H * W
    F = faces.shape[0]

    # ------------- O(B*F) per-face preprocessing (plain-JAX glue) -------------
    v_dp = vertices[:, verts_map, :]                       # (B, Vdp, 3)
    fv = v_dp[:, faces, :].astype(jnp.float32)             # (B, F, 3, 3) world xyz
    fiuv = verts_iuv[:, faces, :].astype(jnp.float32)      # (B, F, 3, 3) vertex IUV

    R = jnp.asarray(cam_R, jnp.float32)
    T = jnp.asarray(cam_t, jnp.float32)
    # PyTorch3D row-vector convention: cam = world @ R + T
    cam = jnp.einsum('bfki,ij->bfkj', fv, R) + T           # (B, F, 3, 3)
    Xc, Yc, Zc = cam[..., 0], cam[..., 1], cam[..., 2]     # (B, F, 3)
    Zs = jnp.where(jnp.abs(Zc) < _EPS_Z, _EPS_Z, Zc)
    fx = jnp.float32(focal_length)
    fy = jnp.float32(focal_length)
    cx = jnp.float32(principal_point[0])
    cy = jnp.float32(principal_point[1])
    xs = fx * Xc / Zs + cx                                  # screen x (pixels)
    ys = fy * Yc / Zs + cy                                  # screen y (pixels)

    x0, x1, x2 = xs[..., 0], xs[..., 1], xs[..., 2]
    y0, y1, y2 = ys[..., 0], ys[..., 1], ys[..., 2]
    z0, z1, z2 = Zc[..., 0], Zc[..., 1], Zc[..., 2]

    # edge functions w_k(px, py) = A_k + B_k*px + C_k*py ; area = A0+A1+A2
    A0, B0, C0 = x1 * y2 - x2 * y1, y1 - y2, x2 - x1
    A1, B1, C1 = x2 * y0 - x0 * y2, y2 - y0, x0 - x2
    A2, B2, C2 = x0 * y1 - x1 * y0, y0 - y1, x1 - x0
    area = A0 + A1 + A2                                     # (B, F), per-face const
    area_safe = jnp.where(jnp.abs(area) < _EPS_AREA, _EPS_AREA, area)
    inv_area = 1.0 / area_safe
    valid = ((jnp.abs(area) > _EPS_AREA)
             & (z0 > _Z_NEAR) & (z1 > _Z_NEAR) & (z2 > _Z_NEAR))

    def sc(a):                                              # pre-divide by area
        return a * inv_area

    geom = jnp.stack([
        jnp.where(valid, sc(A0), -_BIG), sc(B0), sc(C0),    # invalid face -> b0 < 0
        sc(A1), sc(B1), sc(C1),
        sc(A2), sc(B2), sc(C2),
        sc(A0 * z0 + A1 * z1 + A2 * z2),
        sc(B0 * z0 + B1 * z1 + B2 * z2),
        sc(C0 * z0 + C1 * z1 + C2 * z2),
    ], axis=-1)                                             # (B, F, 12)

    f0, f1, f2 = fiuv[:, :, 0, :], fiuv[:, :, 1, :], fiuv[:, :, 2, :]   # (B, F, 3)
    ia = (A0[..., None] * f0 + A1[..., None] * f1 + A2[..., None] * f2) * inv_area[..., None]
    ib = (B0[..., None] * f0 + B1[..., None] * f1 + B2[..., None] * f2) * inv_area[..., None]
    ic = (C0[..., None] * f0 + C1[..., None] * f1 + C2[..., None] * f2) * inv_area[..., None]
    iuvc = jnp.transpose(jnp.concatenate([ia, ib, ic], axis=-1), (0, 2, 1))  # (B, 9, F)

    # ------------- tiling / padding -------------------------------------------
    F_tile = f_tile if F > f_tile else _round_up(F, 8)
    F_pad = _round_up(F, F_tile)
    HW_tile = hw_tile if HW > hw_tile else _round_up(HW, 128)
    HW_pad = _round_up(HW, HW_tile)

    geom = jnp.pad(geom, ((0, 0), (0, F_pad - F), (0, 0)))
    if F_pad > F:
        geom = geom.at[:, F:, 0].set(-_BIG)                 # padded faces never win
    iuvc = jnp.pad(iuvc, ((0, 0), (0, 16 - 9), (0, F_pad - F)))   # (B, 16, F_pad)

    lane = jnp.arange(HW, dtype=jnp.int32)
    px = (lane % W).astype(jnp.float32) + 0.5
    py = (lane // W).astype(jnp.float32) + 0.5
    pxy = jnp.pad(jnp.stack([px, py], axis=0), ((0, 0), (0, HW_pad - HW)))  # (2, HW_pad)

    n_t = HW_pad // HW_tile
    n_fc = F_pad // F_tile

    grid_spec = pltpu.PrefetchScalarGridSpec(
        num_scalar_prefetch=0,
        grid=(B, n_t, n_fc),                                # face-chunk axis last
        in_specs=[
            pl.BlockSpec((2, HW_tile), lambda b, t, fc: (0, t)),
            pl.BlockSpec((1, F_tile, 12), lambda b, t, fc: (b, fc, 0)),
            pl.BlockSpec((1, 16, F_tile), lambda b, t, fc: (b, 0, fc)),
        ],
        out_specs=[
            pl.BlockSpec((1, 3, HW_tile), lambda b, t, fc: (b, 0, t)),
            pl.BlockSpec((1, 1, HW_tile), lambda b, t, fc: (b, 0, t)),
        ],
    )

    iuv_flat, depth_flat = pl.pallas_call(
        _raster_kernel,
        out_shape=(jax.ShapeDtypeStruct((B, 3, HW_pad), jnp.float32),
                   jax.ShapeDtypeStruct((B, 1, HW_pad), jnp.float32)),
        grid_spec=grid_spec,
        compiler_params=pltpu.CompilerParams(
            dimension_semantics=("parallel", "parallel", "arbitrary"),
            vmem_limit_bytes=32 * 1024 * 1024),
    )(pxy, geom, iuvc)

    iuv_images = iuv_flat[:, :, :HW].reshape(B, 3, H, W).transpose(0, 2, 3, 1)
    depth_images = depth_flat[:, 0, :HW].reshape(B, H, W)
    return {"iuv_images": iuv_images, "depth_images": depth_images}


if __name__ == "__main__":
    key = jax.random.PRNGKey(0)
    kmap, kfaces, kparts, kuv, kverts = jax.random.split(key, 5)

    # small deterministic "DensePose"-style tables (shapes consistent with module)
    B, N, Vdp, F, H, W = 2, 32, 48, 64, 16, 16

    verts_map = jax.random.randint(kmap, (Vdp,), 0, N)                 # (Vdp,)
    faces = jax.random.randint(kfaces, (F, 3), 0, Vdp)                 # (F, 3)
    parts = jax.random.randint(kparts, (Vdp, 1), 1, 25).astype(jnp.float32)
    uv = jax.random.uniform(kuv, (Vdp, 2), dtype=jnp.float32)
    verts_iuv = jnp.broadcast_to(
        jnp.concatenate([parts, uv], axis=1)[None], (B, Vdp, 3))       # (B, Vdp, 3)

    vertices = jax.random.uniform(kverts, (B, N, 3), dtype=jnp.float32,
                                  minval=-0.5, maxval=0.5)             # (B, N, 3)

    # default camera of the module: R = diag(-1,-1,1), T = (0,0.2,2.5)*(-1,-1,1)
    cam_R = jnp.array([[-1.0, 0.0, 0.0],
                       [0.0, -1.0, 0.0],
                       [0.0, 0.0, 1.0]], jnp.float32)
    cam_t = jnp.array([0.0, 0.2, 2.5], jnp.float32) * jnp.array([-1.0, -1.0, 1.0],
                                                                jnp.float32)
    focal = 300.0 * (W / 256.0)            # default focal scaled to the small image
    principal_point = (W / 2.0, H / 2.0)   # (cx, cy) = (img_shape[1]/2, img_shape[0]/2)

    out = textured_iuv_render(vertices, verts_map, verts_iuv, faces,
                              cam_R, cam_t, focal, principal_point, (H, W))
    jax.block_until_ready(out)

    assert out["iuv_images"].shape == (B, H, W, 3)
    assert out["iuv_images"].dtype == jnp.float32
    assert out["depth_images"].shape == (B, H, W)
    assert out["depth_images"].dtype == jnp.float32
    print("KERNEL_OK")
</pallas_src>

<mosaic_0001>
module attributes {stable_mosaic.version = 11 : i64} {
  func.func @_raster_kernel(%arg0: i32, %arg1: i32, %arg2: i32, %arg3: memref<2x256xf32, #tpu.memory_space<vmem>>, %arg4: memref<1x64x12xf32, #tpu.memory_space<vmem>>, %arg5: memref<1x16x64xf32, #tpu.memory_space<vmem>>, %arg6: memref<1x3x256xf32, #tpu.memory_space<vmem>>, %arg7: memref<1x1x256xf32, #tpu.memory_space<vmem>>) attributes {dimension_semantics = [#tpu.dimension_semantics<parallel>, #tpu.dimension_semantics<parallel>, #tpu.dimension_semantics<arbitrary>], iteration_bounds = array<i64: 2, 1, 1>, scalar_prefetch = 0 : i64, scratch_operands = 0 : i64, tpu.core_type = #tpu.core_type<tc>, window_params = [{transform_indices = @transform_0, window_bounds = array<i64: 2, 256>}, {transform_indices = @transform_1, window_bounds = array<i64: 1, 64, 12>}, {transform_indices = @transform_2, window_bounds = array<i64: 1, 16, 64>}, {transform_indices = @transform_3, window_bounds = array<i64: 1, 3, 256>}, {transform_indices = @transform_4, window_bounds = array<i64: 1, 1, 256>}]} {
    %c0_i32 = arith.constant 0 : i32
    %0 = arith.cmpi eq, %arg2, %c0_i32 : i32
    %1 = arith.extui %0 : i1 to i32
    %c0_i32_0 = arith.constant 0 : i32
    %2 = arith.cmpi ne, %1, %c0_i32_0 : i32
    scf.if %2 {
      %cst_28 = arith.constant 0.000000e+00 : f32
      %102 = vector.broadcast %cst_28 : f32 to vector<1x3x256xf32>
      %c0_29 = arith.constant 0 : index
      %c0_30 = arith.constant 0 : index
      %c0_31 = arith.constant 0 : index
      %103 = vector.load %arg6[%c0_29, %c0_30, %c0_31] : memref<1x3x256xf32, #tpu.memory_space<vmem>>, vector<1x3x256xf32>
      tpu.vector_store %arg6[%c0_29, %c0_30, %c0_31], %102 {strides = array<i32>} : memref<1x3x256xf32, #tpu.memory_space<vmem>>, vector<1x3x256xf32>,
      %cst_32 = arith.constant 1.000000e+10 : f32
      %104 = vector.broadcast %cst_32 : f32 to vector<1x1x256xf32>
      %c0_33 = arith.constant 0 : index
      %c0_34 = arith.constant 0 : index
      %c0_35 = arith.constant 0 : index
      %105 = vector.load %arg7[%c0_33, %c0_34, %c0_35] : memref<1x1x256xf32, #tpu.memory_space<vmem>>, vector<1x1x256xf32>
      tpu.vector_store %arg7[%c0_33, %c0_34, %c0_35], %104 {strides = array<i32>} : memref<1x1x256xf32, #tpu.memory_space<vmem>>, vector<1x1x256xf32>,
    } else {
    }
    %c0 = arith.constant 0 : index
    %c0_1 = arith.constant 0 : index
    %3 = vector.load %arg3[%c0, %c0_1] : memref<2x256xf32, #tpu.memory_space<vmem>>, vector<1x256xf32>
    %c1 = arith.constant 1 : index
    %c0_2 = arith.constant 0 : index
    %4 = vector.load %arg3[%c1, %c0_2] : memref<2x256xf32, #tpu.memory_space<vmem>>, vector<1x256xf32>
    %c0_3 = arith.constant 0 : index
    %c0_4 = arith.constant 0 : index
    %c0_5 = arith.constant 0 : index
    %5 = vector.load %arg4[%c0_3, %c0_4, %c0_5] : memref<1x64x12xf32, #tpu.memory_space<vmem>>, vector<1x64x12xf32>
    %6 = vector.shape_cast %5 : vector<1x64x12xf32> to vector<64x12xf32>
    %c0_6 = arith.constant 0 : index
    %c0_7 = arith.constant 0 : index
    %c0_8 = arith.constant 0 : index
    %7 = vector.load %arg5[%c0_6, %c0_7, %c0_8] : memref<1x16x64xf32, #tpu.memory_space<vmem>>, vector<1x16x64xf32>
    %8 = vector.shape_cast %7 : vector<1x16x64xf32> to vector<16x64xf32>
    %9 = vector.extract_strided_slice %6 {offsets = [0, 0], sizes = [64, 1], strides = [1, 1]} : vector<64x12xf32> to vector<64x1xf32>
    %10 = vector.extract_strided_slice %6 {offsets = [0, 1], sizes = [64, 1], strides = [1, 1]} : vector<64x12xf32> to vector<64x1xf32>
    %11 = vector.broadcast %10 : vector<64x1xf32> to vector<64x256xf32>
    %12 = vector.broadcast %3 : vector<1x256xf32> to vector<64x256xf32>
    %13 = arith.mulf %11, %12 : vector<64x256xf32>
    %14 = vector.broadcast %9 : vector<64x1xf32> to vector<64x256xf32>
    %15 = arith.addf %14, %13 : vector<64x256xf32>
    %16 = vector.extract_strided_slice %6 {offsets = [0, 2], sizes = [64, 1], strides = [1, 1]} : vector<64x12xf32> to vector<64x1xf32>
    %17 = vector.broadcast %16 : vector<64x1xf32> to vector<64x256xf32>
    %18 = vector.broadcast %4 : vector<1x256xf32> to vector<64x256xf32>
    %19 = arith.mulf %17, %18 : vector<64x256xf32>
    %20 = arith.addf %15, %19 : vector<64x256xf32>
    %21 = vector.extract_strided_slice %6 {offsets = [0, 3], sizes = [64, 1], strides = [1, 1]} : vector<64x12xf32> to vector<64x1xf32>
    %22 = vector.extract_strided_slice %6 {offsets = [0, 4], sizes = [64, 1], strides = [1, 1]} : vector<64x12xf32> to vector<64x1xf32>
    %23 = vector.broadcast %22 : vector<64x1xf32> to vector<64x256xf32>
    %24 = vector.broadcast %3 : vector<1x256xf32> to vector<64x256xf32>
    %25 = arith.mulf %23, %24 : vector<64x256xf32>
    %26 = vector.broadcast %21 : vector<64x1xf32> to vector<64x256xf32>
    %27 = arith.addf %26, %25 : vector<64x256xf32>
    %28 = vector.extract_strided_slice %6 {offsets = [0, 5], sizes = [64, 1], strides = [1, 1]} : vector<64x12xf32> to vector<64x1xf32>
    %29 = vector.broadcast %28 : vector<64x1xf32> to vector<64x256xf32>
    %30 = vector.broadcast %4 : vector<1x256xf32> to vector<64x256xf32>
    %31 = arith.mulf %29, %30 : vector<64x256xf32>
    %32 = arith.addf %27, %31 : vector<64x256xf32>
    %33 = vector.extract_strided_slice %6 {offsets = [0, 6], sizes = [64, 1], strides = [1, 1]} : vector<64x12xf32> to vector<64x1xf32>
    %34 = vector.extract_strided_slice %6 {offsets = [0, 7], sizes = [64, 1], strides = [1, 1]} : vector<64x12xf32> to vector<64x1xf32>
    %35 = vector.broadcast %34 : vector<64x1xf32> to vector<64x256xf32>
    %36 = vector.broadcast %3 : vector<1x256xf32> to vector<64x256xf32>
    %37 = arith.mulf %35, %36 : vector<64x256xf32>
    %38 = vector.broadcast %33 : vector<64x1xf32> to vector<64x256xf32>
    %39 = arith.addf %38, %37 : vector<64x256xf32>
    %40 = vector.extract_strided_slice %6 {offsets = [0, 8], sizes = [64, 1], strides = [1, 1]} : vector<64x12xf32> to vector<64x1xf32>
    %41 = vector.broadcast %40 : vector<64x1xf32> to vector<64x256xf32>
    %42 = vector.broadcast %4 : vector<1x256xf32> to vector<64x256xf32>
    %43 = arith.mulf %41, %42 : vector<64x256xf32>
    %44 = arith.addf %39, %43 : vector<64x256xf32>
    %cst = arith.constant 0.000000e+00 : f32
    %45 = vector.broadcast %cst : f32 to vector<64x256xf32>
    %46 = arith.cmpf oge, %20, %45 : vector<64x256xf32>
    %cst_9 = arith.constant 0.000000e+00 : f32
    %47 = vector.broadcast %cst_9 : f32 to vector<64x256xf32>
    %48 = arith.cmpf oge, %32, %47 : vector<64x256xf32>
    %49 = arith.andi %46, %48 : vector<64x256xi1>
    %cst_10 = arith.constant 0.000000e+00 : f32
    %50 = vector.broadcast %cst_10 : f32 to vector<64x256xf32>
    %51 = arith.cmpf oge, %44, %50 : vector<64x256xf32>
    %52 = arith.andi %49, %51 : vector<64x256xi1>
    %53 = vector.extract_strided_slice %6 {offsets = [0, 9], sizes = [64, 1], strides = [1, 1]} : vector<64x12xf32> to vector<64x1xf32>
    %54 = vector.extract_strided_slice %6 {offsets = [0, 10], sizes = [64, 1], strides = [1, 1]} : vector<64x12xf32> to vector<64x1xf32>
    %55 = vector.broadcast %54 : vector<64x1xf32> to vector<64x256xf32>
    %56 = vector.broadcast %3 : vector<1x256xf32> to vector<64x256xf32>
    %57 = arith.mulf %55, %56 : vector<64x256xf32>
    %58 = vector.broadcast %53 : vector<64x1xf32> to vector<64x256xf32>
    %59 = arith.addf %58, %57 : vector<64x256xf32>
    %60 = vector.extract_strided_slice %6 {offsets = [0, 11], sizes = [64, 1], strides = [1, 1]} : vector<64x12xf32> to vector<64x1xf32>
    %61 = vector.broadcast %60 : vector<64x1xf32> to vector<64x256xf32>
    %62 = vector.broadcast %4 : vector<1x256xf32> to vector<64x256xf32>
    %63 = arith.mulf %61, %62 : vector<64x256xf32>
    %64 = arith.addf %59, %63 : vector<64x256xf32>
    %cst_11 = arith.constant 1.000000e+10 : f32
    %65 = vector.broadcast %cst_11 : f32 to vector<64x256xf32>
    %66 = arith.select %52, %64, %65 : vector<64x256xi1>, vector<64x256xf32>
    %cst_12 = arith.constant dense<0x7F800000> : vector<256xf32>
    %67 = vector.multi_reduction <minimumf>, %66, %cst_12 [0] : vector<64x256xf32> to vector<256xf32>
    %68 = vector.shape_cast %67 : vector<256xf32> to vector<1x256xf32>
    %69 = vector.broadcast %68 : vector<1x256xf32> to vector<64x256xf32>
    %70 = arith.cmpf ole, %66, %69 : vector<64x256xf32>
    %71 = arith.andi %70, %52 : vector<64x256xi1>
    %72 = arith.extui %71 : vector<64x256xi1> to vector<64x256xi32>
    %73 = arith.sitofp %72 : vector<64x256xi32> to vector<64x256xf32>
    %cst_13 = arith.constant dense<0.000000e+00> : vector<16x256xf32>
    %74 = tpu.matmul %8, %73, %cst_13 {dimension_numbers = #tpu.dot_dimension_numbers<[1], [0], [0], [1], [0, 0, 1, 1], [], []>} : vector<16x64xf32>, vector<64x256xf32>, vector<16x256xf32> -> vector<16x256xf32>
    %75 = vector.extract_strided_slice %74 {offsets = [0, 0], sizes = [3, 256], strides = [1, 1]} : vector<16x256xf32> to vector<3x256xf32>
    %76 = vector.extract_strided_slice %74 {offsets = [3, 0], sizes = [3, 256], strides = [1, 1]} : vector<16x256xf32> to vector<3x256xf32>
    %77 = vector.broadcast %3 : vector<1x256xf32> to vector<3x256xf32>
    %78 = arith.mulf %76, %77 : vector<3x256xf32>
    %79 = arith.addf %75, %78 : vector<3x256xf32>
    %80 = vector.extract_strided_slice %74 {offsets = [6, 0], sizes = [3, 256], strides = [1, 1]} : vector<16x256xf32> to vector<3x256xf32>
    %81 = vector.broadcast %4 : vector<1x256xf32> to vector<3x256xf32>
    %82 = arith.mulf %80, %81 : vector<3x256xf32>
    %83 = arith.addf %79, %82 : vector<3x256xf32>
    %c0_14 = arith.constant 0 : index
    %c0_15 = arith.constant 0 : index
    %c0_16 = arith.constant 0 : index
    %84 = vector.load %arg7[%c0_14, %c0_15, %c0_16] : memref<1x1x256xf32, #tpu.memory_space<vmem>>, vector<1x1x256xf32>
    %85 = vector.shape_cast %84 : vector<1x1x256xf32> to vector<1x256xf32>
    %86 = arith.cmpf olt, %68, %85 : vector<1x256xf32>
    %87 = arith.select %86, %68, %85 : vector<1x256xi1>, vector<1x256xf32>
    %c0_17 = arith.constant 0 : index
    %c0_18 = arith.constant 0 : index
    %c0_19 = arith.constant 0 : index
    %88 = vector.load %arg7[%c0_17, %c0_18, %c0_19] : memref<1x1x256xf32, #tpu.memory_space<vmem>>, vector<1x1x256xf32>
    %89 = vector.shape_cast %88 : vector<1x1x256xf32> to vector<1x256xf32>
    %90 = vector.shape_cast %87 : vector<1x256xf32> to vector<1x1x256xf32>
    tpu.vector_store %arg7[%c0_17, %c0_18, %c0_19], %90 {strides = array<i32>} : memref<1x1x256xf32, #tpu.memory_space<vmem>>, vector<1x1x256xf32>,
    %c0_20 = arith.constant 0 : index
    %c0_21 = arith.constant 0 : index
    %c0_22 = arith.constant 0 : index
    %91 = vector.load %arg6[%c0_20, %c0_21, %c0_22] : memref<1x3x256xf32, #tpu.memory_space<vmem>>, vector<1x3x256xf32>
    %92 = vector.shape_cast %91 : vector<1x3x256xf32> to vector<3x256xf32>
    %93 = vector.shape_cast %86 : vector<1x256xi1> to vector<1x256xi1>
    %94 = vector.broadcast %93 : vector<1x256xi1> to vector<3x256xi1>
    %95 = arith.select %94, %83, %92 : vector<3x256xi1>, vector<3x256xf32>
    %c0_23 = arith.constant 0 : index
    %c0_24 = arith.constant 0 : index
    %c0_25 = arith.constant 0 : index
    %96 = vector.load %arg6[%c0_23, %c0_24, %c0_25] : memref<1x3x256xf32, #tpu.memory_space<vmem>>, vector<1x3x256xf32>
    %97 = vector.shape_cast %96 : vector<1x3x256xf32> to vector<3x256xf32>
    %98 = vector.shape_cast %95 : vector<3x256xf32> to vector<1x3x256xf32>
    tpu.vector_store %arg6[%c0_23, %c0_24, %c0_25], %98 {strides = array<i32>} : memref<1x3x256xf32, #tpu.memory_space<vmem>>, vector<1x3x256xf32>,
    %c0_i32_26 = arith.constant 0 : i32
    %99 = arith.cmpi eq, %arg2, %c0_i32_26 : i32
    %100 = arith.extui %99 : i1 to i32
    %c0_i32_27 = arith.constant 0 : i32
    %101 = arith.cmpi ne, %100, %c0_i32_27 : i32
    scf.if %101 {
      %c0_28 = arith.constant 0 : index
      %c0_29 = arith.constant 0 : index
      %c0_30 = arith.constant 0 : index
      %102 = vector.load %arg7[%c0_28, %c0_29, %c0_30] : memref<1x1x256xf32, #tpu.memory_space<vmem>>, vector<1x1x256xf32>
      %103 = vector.shape_cast %102 : vector<1x1x256xf32> to vector<1x256xf32>
      %cst_31 = arith.constant 5.000000e+09 : f32
      %104 = vector.broadcast %cst_31 : f32 to vector<1x256xf32>
      %105 = arith.cmpf oge, %103, %104 : vector<1x256xf32>
      %cst_32 = arith.constant -1.000000e+00 : f32
      %106 = vector.broadcast %cst_32 : f32 to vector<1x256xf32>
      %107 = arith.select %105, %106, %103 : vector<1x256xi1>, vector<1x256xf32>
      %c0_33 = arith.constant 0 : index
      %c0_34 = arith.constant 0 : index
      %c0_35 = arith.constant 0 : index
      %108 = vector.load %arg7[%c0_33, %c0_34, %c0_35] : memref<1x1x256xf32, #tpu.memory_space<vmem>>, vector<1x1x256xf32>
      %109 = vector.shape_cast %108 : vector<1x1x256xf32> to vector<1x256xf32>
      %110 = vector.shape_cast %107 : vector<1x256xf32> to vector<1x1x256xf32>
      tpu.vector_store %arg7[%c0_33, %c0_34, %c0_35], %110 {strides = array<i32>} : memref<1x1x256xf32, #tpu.memory_space<vmem>>, vector<1x1x256xf32>,
    } else {
    }
    return
  }
  func.func @transform_0(%arg0: i32, %arg1: i32, %arg2: i32) -> (i32, i32) {
    %c0_i32 = arith.constant 0 : i32
    %c0_i32_0 = arith.constant 0 : i32
    return %c0_i32, %arg1 : i32, i32
  }
  func.func @transform_1(%arg0: i32, %arg1: i32, %arg2: i32) -> (i32, i32, i32) {
    %c0_i32 = arith.constant 0 : i32
    %c0_i32_0 = arith.constant 0 : i32
    return %arg0, %arg2, %c0_i32 : i32, i32, i32
  }
  func.func @transform_2(%arg0: i32, %arg1: i32, %arg2: i32) -> (i32, i32, i32) {
    %c0_i32 = arith.constant 0 : i32
    %c0_i32_0 = arith.constant 0 : i32
    return %arg0, %c0_i32, %arg2 : i32, i32, i32
  }
  func.func @transform_3(%arg0: i32, %arg1: i32, %arg2: i32) -> (i32, i32, i32) {
    %c0_i32 = arith.constant 0 : i32
    %c0_i32_0 = arith.constant 0 : i32
    return %arg0, %c0_i32, %arg1 : i32, i32, i32
  }
  func.func @transform_4(%arg0: i32, %arg1: i32, %arg2: i32) -> (i32, i32, i32) {
    %c0_i32 = arith.constant 0 : i32
    %c0_i32_0 = arith.constant 0 : i32
    return %arg0, %c0_i32, %arg1 : i32, i32, i32
  }
}

</mosaic_0001>

<bundles_post_ra>
// kernel: tpu_custom_call.1
= control target key start
LH: loop header
LB: loop body
LE: loop exit
PB: predicated region body
PF: predicated region fallthrough
CT: control target
= control target key end

     0   :  { %10 = vsyncpa [#allocation3], 0  ;;  %s2893_s0 = inlined_call_operand.vmem [shape: f32[2,256], index: 0, kind: input, shape index: {}]   ;;  %s2894_s1 = inlined_call_operand.vmem [shape: f32[2,64,12], index: 1, kind: input, shape index: {}]   ;;  %s2895_s2 = inlined_call_operand.vmem [shape: f32[2,16,64], index: 2, kind: input, shape index: {}]   ;;  %s2896_s3 = inlined_call_operand.vmem [shape: f32[2,3,256], index: 3, kind: output, shape index: {0}]   ;;  %s2897_s4 = inlined_call_operand.hbm [shape: f32[2,1,256], index: 4, kind: output, shape index: {1}]  }
   0x1   :  { %12 = vsyncpa [#allocation3 + $0x1], 0  ;;  %s1861_s15 = smov 0   ;;  %s1863_s16 = smov 0  }
   0x2   :  { %s1865_s17 = smov 0   ;;  %s1867_s18 = smov 0  }
   0x3   :  { %s1869_s19 = smov 0   ;;  %s1871_s20 = smov 0  }
   0x4 LB: > { %s1551_s21 = sadd.s32 4294967295, %s1817_s20   ;;  %s1552_s22 = sadd.s32 4294967294, %s1817_s20   ;;  %s1817_s20 = sphi %s1871_s20, %s18_s20   ;;  %s1813_s19 = sphi %s1869_s19, %s3016_s19   ;;  %s1809_s18 = sphi %s1867_s18, %s3015_s18   ;;  %s1805_s17 = sphi %s1865_s17, %s3014_s17   ;;  %s1801_s16 = sphi %s1863_s16, %s3013_s16   ;;  %s1797_s15 = sphi %s1861_s15, %s3012_s15  }
   0x5   : > { %s37_s23 = sadd.s32 1, %s1813_s19  ;;  %s156_s24 = sadd.s32 1, %s1805_s17 }
   0x6   : > { %p39_p0 = scmp.ge.s32.totalorder %s37_s23, 2  ;;  %p166_p1 = scmp.ne.s32.totalorder %s1805_s17, %s1801_s16 }
   0x7   : > { %p167_p2 = scmp.eq.s32.totalorder %s1551_s21, 1  ;;  %p172_p3 = scmp.ne.s32.totalorder %s1801_s16, %s1797_s15 }
   0x8   : > { %s3018_s23 = smov (%p39_p0, %s37_s23), 0  ;;  %p173_p5 = scmp.eq.s32.totalorder %s1552_s22, 1 }
   0x9   : > { %p1901_p4 = por %p167_p2, %p166_p1  ;;  %s151_s26 = ssub.s32 %s1813_s19, %s3018_s23 }
   0xa   : > { %p1556_p6 = scmp.ge.s32.totalorder %s1817_s20, 1  ;;  %p154_p7 = scmp.eq.s32.totalorder %s151_s26, 0 }
   0xb   : > { %p1908_p8 = por %p173_p5, %p172_p3  ;;  %p224_p9 = scmp.lt.s32.totalorder %s1817_s20, 3 }
   0xc   : > { %s1914_s28 = scalar_select %p154_p7, %s1805_s17, %s156_s24  }
   0xd   : > { %p225_p10 = pnand %p1556_p6, %p224_p9 }
   0xf   : > { %228 = sbr.rel (%p225_p10) target bundleno = 665 (0x299), region = 32 }
  0x14   : > { %p283_p11 = scmp.lt.s32.totalorder %s1809_s18, 1  ;;  %v1819_v0 = vmov 1   ;;  %v2898_v9 = vmov 0   ;;  %v1821_v10 = vmov 2   ;;  %v1822_v11 = vmov 4   ;;  %s273_s12 = sand.u32 1, %s1801_s16  }
  0x15   : > { %1696 = vset.pattern.permute.xlu1 %v1819_v0  ;;  %1695 = vset.pattern.permute.xlu0 %v1819_v0  ;;  %v1823_v12 = vmov 7   ;;  %v2903_v13 = vmov 10   ;;  %v2906_v14 = vmov 5   ;;  %v1826_v15 = vmov 3   ;;  %s1557_s13 = sshll.u32 %s273_s12, 1  ;;  %s1835_s22 = smov [#allocation2]  }
  0x16   : > { %s1918_s29 = scalar_select %p283_p11, %s1809_s18, 1  ;;  %v2905_v16 = vmov 6   ;;  %v2904_v17 = vmov 8   ;;  %v2900_v18 = vlaneseq  ;;  %v2901_v24 = vmov 9  }
  0x17   : > { %v321_v29 = vld [vmem:[%s2893_s0] ss:$2 sm:$0x3]  ;;  %v2907_v40 = vmov 11   ;;  %s2405_s14 = scalar_lea.vmem [#allocation2], %s1557_s13  ;;  %s1382_s13 = scalar_lea.sflag [#allocation3], %s273_s12 }
  0x18   : > { %s1604_s30 = sshll.u32 %s1918_s29, 6  ;;  %v2022_v21 = vshrl.u32 %v2900_v18, 7  ;;  %v1564_v60 = vld [vmem:[%s2893_s0 + $0x1] ss:$2 sm:$0x3]  ;;  %s1606_s21 = sshll.u32 %s1918_s29, 3 }
  0x19   : > { %s290_s7 = scalar_lea.vmem %s2894_s1, %s1604_s30  ;;  %s2442_s26 = scalar_lea.vmem %s2896_s3, %s1606_s21 }
  0x1a   : > { %v1924_v1 = vld [vmem:[%s290_s7 + $0x10] sm:$0xff]  ;;  %v1926_v2 = vld [vmem:[%s290_s7] sm:$0xff]  ;;  %v1930_v3 = vld [vmem:[%s290_s7 + $0x18] sm:$0xff]  ;;  %2923 = vst [vmem:[#allocation5_spill] sm:$0xff] %v2022_v21  ;;  %v2033_v25 = vsub.s32 0, %v2022_v21  ;;  %v2036_v26 = vsub.s32 1, %v2022_v21 }
  0x1b   : > { %346 = vperm.xlu1 %1696, %v1924_v1   ;;  %336 = vperm.xlu0 %1695, %v1926_v2   ;;  %v1932_v4 = vld [vmem:[%s290_s7 + $0x8] sm:$0xff]  ;;  %v1938_v6 = vld [vmem:[%s290_s7 + $0x20] sm:$0xff]  ;;  %v1942_v7 = vld [vmem:[%s290_s7 + $0x38] sm:$0xff]  ;;  %s1605_s30 = sshll.u32 %s1918_s29, 4  ;;  %s1402_s11 = sshll.u32 %s2405_s14, 4  ;;  %s1403_s11 = int_to_ptr.vmem [resolvable:$true] %s1402_s11 }
  0x1c   : > { %v1936_v5 = vld [vmem:[%s290_s7 + $0x28] sm:$0xff]  ;;  %v1944_v8 = vld [vmem:[%s290_s7 + $0x30] sm:$0xff]  ;;  %v2048_v30 = vrot.slane %v321_v29, %v2033_v25  ;;  %v2051_v31 = vrot.slane %v321_v29, %v2036_v26  ;;  %v2129_v0 = vrot.slane %v1564_v60, %v2033_v25  ;;  %s299_s6 = scalar_lea.vmem %s2895_s2, %s1605_s30  ;;  %s1607_s7 = sshll.u32 %s1809_s18, 5 }
  0x1d   : > { %s1400_s10 = scalar_lea.hbm %s2897_s4, %s1607_s7  ;;  %s1741_s21 = scalar_lea.vmem %s1403_s11, 32 }
  0x1e   : > { %p1742_p12 = scmp.ne.s32.totalorder %s1403_s11, %s1741_s21  ;;  %s1745_s24 = sshll.u32 %s1835_s22, 4  ;;  %s1746_s24 = int_to_ptr.vmem [resolvable:$false] %s1745_s24 }
  0x1f   : > { %351 = vperm.xlu1 %1696, %v1930_v3   ;;  %341 = vperm.xlu0 %1695, %v1932_v4   ;;  %s1747_s30 = scalar_lea.vmem %s1746_s24, 64  ;;  %p1748_p1 = scmp.lt.s32.totalorder %s1403_s11, %s1746_s24 }
  0x20   : > { %p1743_p13 = pnand %p1742_p12, %p1901_p4  ;;  %p1749_p2 = scmp.lt.s32.totalorder %s1747_s30, %s1741_s21 }
  0x22   : > { %p1744_p0 = pneg %p1743_p13  ;;  %p1750_p3 = por %p1749_p2, %p1748_p1 }
  0x23   : > { %361 = vperm.xlu1 %1696, %v1936_v5   ;;  %356 = vperm.xlu0 %1695, %v1938_v6  }
  0x24   : > { %p1751_p5 = pnand %p1750_p3, %p1744_p0 }
  0x27   : > { %371 = vperm.xlu1 %1696, %v1942_v7   ;;  %366 = vperm.xlu0 %1695, %v1944_v8  }
  0x2b   : > { %1698 = vset.pattern.permute.xlu1 %v2898_v9  ;;  %1697 = vset.pattern.permute.xlu0 %v2898_v9 }
  0x2c   : > { %406 = vperm.xlu1 %1698, %v1932_v4   ;;  %402 = vperm.xlu0 %1697, %v1926_v2  }
  0x30   : > { %410 = vperm.xlu1 %1698, %v1924_v1   ;;  %414 = vperm.xlu0 %1697, %v1930_v3  }
  0x34   : > { %418 = vperm.xlu1 %1698, %v1938_v6   ;;  %422 = vperm.xlu0 %1697, %v1936_v5  }
  0x38   : > { %426 = vperm.xlu1 %1698, %v1944_v8   ;;  %430 = vperm.xlu0 %1697, %v1942_v7  }
  0x3c   : > { %1699 = vset.pattern.permute.xlu1 %v1821_v10  ;;  %1700 = vset.pattern.permute.xlu0 %v1822_v11 }
  0x3d   : > { %450 = vperm.xlu1 %1699, %v1926_v2   ;;  %525 = vperm.xlu0 %1700, %v1926_v2  }
  0x41   : > { %1701 = vset.pattern.permute.xlu1 %v1822_v11  ;;  %537 = vperm.xlu0 %1700, %v1930_v3  }
  0x42   : > { %529 = vperm.xlu1 %1701, %v1932_v4  }
  0x45   : > { %541 = vperm.xlu0 %1700, %v1938_v6  }
  0x46   : > { %533 = vperm.xlu1 %1701, %v1924_v1  }
  0x49   : > { %1704 = vset.pattern.permute.xlu0 %v1823_v12 }
  0x4a   : > { %1702 = vset.pattern.permute.xlu1 %v1823_v12  ;;  %689 = vperm.xlu0 %1704, %v1932_v4  }
  0x4b   : > { %685 = vperm.xlu1 %1702, %v1926_v2  }
  0x4e   : > { %705 = vperm.xlu0 %1704, %v1936_v5  }
  0x4f   : > { %693 = vperm.xlu1 %1702, %v1924_v1  }
  0x52   : > { %1711 = vset.pattern.permute.xlu0 %v2903_v13 }
  0x53   : > { %697 = vperm.xlu1 %1702, %v1930_v3   ;;  %925 = vperm.xlu0 %1711, %v1926_v2  }
  0x57   : > { %1703 = vset.pattern.permute.xlu1 %v1821_v10  ;;  %937 = vperm.xlu0 %1711, %v1930_v3  }
  0x58   : > { %458 = vperm.xlu1 %1703, %v1924_v1  }
  0x5b   : > { %1713 = vset.pattern.permute.xlu0 %v2906_v14 }
  0x5c   : > { %462 = vperm.xlu1 %1703, %v1930_v3   ;;  %621 = vperm.xlu0 %1713, %v1926_v2  }
  0x60   : > { %1705 = vset.pattern.permute.xlu1 %v1822_v11  ;;  %633 = vperm.xlu0 %1713, %v1930_v3  }
  0x61   : > { %545 = vperm.xlu1 %1705, %v1936_v5  }
  0x64   : > { %641 = vperm.xlu0 %1713, %v1936_v5  }
  0x65   : > { %1706 = vset.pattern.permute.xlu1 %v1826_v15 }
  0x66   : > { %573 = vperm.xlu1 %1706, %v1926_v2  }
  0x68   : > { %1718 = vset.pattern.permute.xlu0 %v1821_v10 }
  0x69   : > { %454 = vperm.xlu0 %1718, %v1932_v4  }
  0x6a   : > { %581 = vperm.xlu1 %1706, %v1924_v1  }
  0x6d   : > { %470 = vperm.xlu0 %1718, %v1936_v5  }
  0x6e   : > { %585 = vperm.xlu1 %1706, %v1930_v3  }
  0x71   : > { %474 = vperm.xlu0 %1718, %v1944_v8  }
  0x72   : > { %1707 = vset.pattern.permute.xlu1 %v2906_v14 }
  0x73   : > { %625 = vperm.xlu1 %1707, %v1932_v4  }
  0x75   : > { %1725 = vset.pattern.permute.xlu0 %v1826_v15 }
  0x76   : > { %577 = vperm.xlu0 %1725, %v1932_v4  }
  0x77   : > { %629 = vperm.xlu1 %1707, %v1924_v1  }
  0x7a   : > { %589 = vperm.xlu0 %1725, %v1938_v6  }
  0x7b   : > { %1708 = vset.pattern.permute.xlu1 %v1823_v12 }
  0x7c   : > { %701 = vperm.xlu1 %1708, %v1938_v6  }
  0x7e   : > { %601 = vperm.xlu0 %1725, %v1942_v7  }
  0x80   : > { %1709 = vset.pattern.permute.xlu1 %v2905_v16 }
  0x81   : > { %733 = vperm.xlu1 %1709, %v1926_v2  }
  0x82   : > { %1728 = vset.pattern.permute.xlu0 %v2905_v16 }
  0x83   : > { %741 = vperm.xlu0 %1728, %v1924_v1  }
  0x85   : > { %737 = vperm.xlu1 %1709, %v1932_v4  }
  0x87   : > { %749 = vperm.xlu0 %1728, %v1938_v6  }
  0x89   : > { %745 = vperm.xlu1 %1709, %v1930_v3  }
  0x8b   : > { %757 = vperm.xlu0 %1728, %v1944_v8  }
  0x8d   : > { %1710 = vset.pattern.permute.xlu1 %v2904_v17 }
  0x8e   : > { %781 = vperm.xlu1 %1710, %v1926_v2  }
  0x8f   : > { %1730 = vset.pattern.permute.xlu0 %v2904_v17 }
  0x90   : > { %785 = vperm.xlu0 %1730, %v1932_v4  }
  0x92   : > { %789 = vperm.xlu1 %1710, %v1924_v1  }
  0x94   : > { %801 = vperm.xlu0 %1730, %v1936_v5  }
  0x96   : > { %v2017_v19 = vpop.permute.xlu1 %346  ;;  %793 = vperm.xlu1 %1710, %v1930_v3   ;;  %v337_v20 = vpop.permute.xlu0 %336 }
  0x97   : > { %v385_v34 = vmul.f32 %v2048_v30, %v337_v20  ;;  %v386_v35 = vmul.f32 %v2051_v31, %v337_v20 }
  0x98   : > { %809 = vperm.xlu0 %1730, %v1942_v7  }
  0x9a   : > { %v2024_v22 = vpop.permute.xlu1 %351  ;;  %1712 = vset.pattern.permute.xlu1 %v2903_v13  ;;  %v2027_v23 = vpop.permute.xlu0 %341 }
  0x9b   : > { %929 = vperm.xlu1 %1712, %v1932_v4   ;;  %v391_v62 = vmul.f32 %v2048_v30, %v2024_v22  ;;  %v392_v63 = vmul.f32 %v2051_v31, %v2024_v22 }
  0x9c   : > { %1733 = vset.pattern.permute.xlu0 %v2901_v24 }
  0x9d   : > { %973 = vperm.xlu0 %1733, %v1926_v2  }
  0x9e   : > { %v2038_v27 = vpop.permute.xlu1 %361  ;;  %v2040_v28 = vpop.permute.xlu0 %356 }
  0x9f   : > { %933 = vperm.xlu1 %1712, %v1924_v1  }
  0xa1   : > { %985 = vperm.xlu0 %1733, %v1930_v3  }
  0xa2   : > { %v2053_v32 = vpop.permute.xlu1 %371  ;;  %v2055_v33 = vpop.permute.xlu0 %366 }
  0xa3   : > { %1714 = vset.pattern.permute.xlu1 %v1821_v10 }
  0xa4   : > { %466 = vperm.xlu1 %1714, %v1938_v6  }
  0xa5   : > { %989 = vperm.xlu0 %1733, %v1938_v6  }
  0xa7   : > { %v2062_v36 = vpop.permute.xlu1 %406  ;;  %v403_v37 = vpop.permute.xlu0 %402 }
  0xa8   : > { %v2064_v38 = vadd.f32 %v403_v37, %v385_v34  ;;  %v2066_v39 = vadd.f32 %v403_v37, %v386_v35  ;;  %1715 = vset.pattern.permute.xlu1 %v1822_v11  ;;  %v2132_v11 = vrot.slane %v1564_v60, %v2036_v26 }
  0xa9   : > { %549 = vperm.xlu1 %1715, %v1944_v8   ;;  %1735 = vset.pattern.permute.xlu0 %v2907_v40 }
  0xaa   : > { %1025 = vperm.xlu0 %1735, %v1932_v4  }
  0xab   : > { %v2072_v41 = vpop.permute.xlu1 %410  ;;  %v415_v42 = vpop.permute.xlu0 %414 }
  0xac   : > { %v439_v29 = vadd.f32 %v415_v42, %v391_v62  ;;  %v440_v34 = vadd.f32 %v415_v42, %v392_v63 }
  0xad   : > { %553 = vperm.xlu1 %1715, %v1942_v7  }
  0xae   : > { %1041 = vperm.xlu0 %1735, %v1936_v5  }
  0xaf   : > { %v2076_v43 = vpop.permute.xlu1 %418  ;;  %v2078_v44 = vpop.permute.xlu0 %422 }
  0xb1   : > { %1716 = vset.pattern.permute.xlu1 %v1826_v15 }
  0xb2   : > { %593 = vperm.xlu1 %1716, %v1936_v5   ;;  %1045 = vperm.xlu0 %1735, %v1944_v8  }
  0xb3   : > { %v2083_v45 = vpop.permute.xlu1 %426  ;;  %v2085_v46 = vpop.permute.xlu0 %430 }
  0xb6   : > { %1717 = vset.pattern.permute.xlu1 %v2906_v14 }
  0xb7   : > { %637 = vperm.xlu1 %1717, %v1938_v6  }
  0xb8   : > { %v451_v47 = vpop.permute.xlu1 %450  ;;  %v526_v48 = vpop.permute.xlu0 %525 }
  0xb9   : > { %v557_v42 = vmul.f32 %v526_v48, %v2051_v31  ;;  %v493_v62 = vmul.f32 %v2132_v11, %v451_v47 }
  0xbb   : > { %1719 = vset.pattern.permute.xlu1 %v1823_v12 }
  0xbc   : > { %709 = vperm.xlu1 %1719, %v1944_v8   ;;  %v538_v49 = vpop.permute.xlu0 %537 }
  0xbd   : > { %v2091_v50 = vpop.permute.xlu1 %529 }
  0xc0   : > { %713 = vperm.xlu1 %1719, %v1942_v7   ;;  %v2094_v51 = vpop.permute.xlu0 %541 }
  0xc1   : > { %v2096_v52 = vpop.permute.xlu1 %533 }
  0xc4   : > { %1720 = vset.pattern.permute.xlu1 %v2905_v16 }
  0xc5   : > { %753 = vperm.xlu1 %1720, %v1936_v5   ;;  %v2100_v53 = vpop.permute.xlu0 %689 }
  0xc6   : > { %v2102_v54 = vpop.permute.xlu1 %685 }
  0xc9   : > { %1721 = vset.pattern.permute.xlu1 %v2904_v17  ;;  %v2105_v55 = vpop.permute.xlu0 %705  ;;  %v509_v17 = vadd.f32 %v493_v62, %v2066_v39  ;;  %v387_v39 = vmul.f32 %v2048_v30, %v2027_v23 }
  0xca   : > { %797 = vperm.xlu1 %1721, %v1938_v6   ;;  %v2108_v56 = vpop.permute.xlu1 %693 }
  0xcb   : > { %vm845_vm3 = vcmp.ge.f32.partialorder %v509_v17, 0.0  ;;  %v388_v17 = vmul.f32 %v2051_v31, %v2027_v23 }
  0xcd   : > { %v436_v23 = vadd.f32 %v2062_v36, %v388_v17 }
  0xce   : > { %1722 = vset.pattern.permute.xlu1 %v2903_v13  ;;  %v2111_v57 = vpop.permute.xlu1 %697  ;;  %v2113_v58 = vpop.permute.xlu0 %925  ;;  %v556_v13 = vmul.f32 %v526_v48, %v2048_v30 }
  0xcf   : > { %941 = vperm.xlu1 %1722, %v1938_v6  }
  0xd2   : > { %v2116_v59 = vpop.permute.xlu0 %937 }
  0xd3   : > { %945 = vperm.xlu1 %1722, %v1936_v5   ;;  %v2122_v61 = vpop.permute.xlu1 %458 }
  0xd7   : > { %1723 = vset.pattern.permute.xlu1 %v2901_v24  ;;  %v463_v12 = vpop.permute.xlu1 %462  ;;  %v622_v20 = vpop.permute.xlu0 %621  ;;  %v492_v24 = vmul.f32 %v2129_v0, %v451_v47 }
  0xd8   : > { %v498_v35 = vmul.f32 %v2129_v0, %v463_v12  ;;  %v499_v37 = vmul.f32 %v2132_v11, %v463_v12  ;;  %977 = vperm.xlu1 %1723, %v1932_v4   ;;  %v652_v4 = vmul.f32 %v622_v20, %v2129_v0  ;;  %v653_v12 = vmul.f32 %v622_v20, %v2132_v11 }
  0xd9   : > { %v562_v20 = vmul.f32 %v538_v49, %v2048_v30 }
  0xda   : > { %v514_v9 = vadd.f32 %v498_v35, %v439_v29  ;;  %v2138_v22 = vadd.f32 %v499_v37, %v440_v34  ;;  %v508_v29 = vadd.f32 %v492_v24, %v2064_v38 }
  0xdb   : > { %v634_v18 = vpop.permute.xlu0 %633 }
  0xdc   : > { %981 = vperm.xlu1 %1723, %v1924_v1   ;;  %v2141_v60 = vpop.permute.xlu1 %545  ;;  %vm844_vm0 = vcmp.ge.f32.partialorder %v508_v29, 0.0  ;;  %v659_v24 = vmul.f32 %v634_v18, %v2132_v11  ;;  %v390_v29 = vmul.f32 %v2051_v31, %v2017_v19  ;;  %vm850_vm6 = vcmp.ge.f32.partialorder %v514_v9, 0.0 }
  0xdd   : > { %vm851_vm9 = vcmp.ge.f32.partialorder %v2138_v22, 0.0  ;;  %v561_v22 = vmul.f32 %v2096_v52, %v2051_v31 }
  0xde   : > { %v438_v9 = vadd.f32 %v2072_v41, %v390_v29 }
  0xdf   : > { %v2147_v63 = vpop.permute.xlu0 %641 }
  0xe0   : > { %1724 = vset.pattern.permute.xlu1 %v2907_v40  ;;  %v563_v40 = vmul.f32 %v538_v49, %v2051_v31 }
  0xe1   : > { %1021 = vperm.xlu1 %1724, %v1926_v2   ;;  %v574_v34 = vpop.permute.xlu1 %573  ;;  %v2948_v2 = vmov 0 }
  0xe2   : > { %v604_v35 = vadd.f32 %v574_v34, %v556_v13  ;;  %v605_v37 = vadd.f32 %v574_v34, %v557_v42  ;;  %v658_v13 = vmul.f32 %v634_v18, %v2129_v0  ;;  %v435_v34 = vadd.f32 %v2062_v36, %v387_v39 }
  0xe3   : > { %v559_v36 = vmul.f32 %v2091_v50, %v2051_v31 }
  0xe4   : > { %v668_v48 = vadd.f32 %v652_v4, %v604_v35  ;;  %v669_v16 = vadd.f32 %v653_v12, %v605_v37  ;;  %v455_v47 = vpop.permute.xlu0 %454  ;;  %v389_v12 = vmul.f32 %v2048_v30, %v2017_v19  ;;  %v560_v37 = vmul.f32 %v2096_v52, %v2048_v30 }
  0xe5   : > { %1029 = vperm.xlu1 %1724, %v1924_v1   ;;  %v582_v14 = vpop.permute.xlu1 %581  ;;  %v495_v19 = vmul.f32 %v2132_v11, %v455_v47 }
  0xe6   : > { %vm860_vm1 = vcmp.ge.f32.partialorder %v668_v48, 0.0  ;;  %vm861_vm2 = vcmp.ge.f32.partialorder %v669_v16, 0.0  ;;  %v437_v35 = vadd.f32 %v2072_v41, %v389_v12  ;;  %v394_v48 = vmul.f32 %v2051_v31, %v2040_v28 }
  0xe7   : > { %vm2158_vm4 = vmand %vm844_vm0, %vm860_vm1 }
  0xe8   : > { %vm2164_vm5 = vmand %vm845_vm3, %vm861_vm2  ;;  %v2168_v1 = vpop.permute.xlu0 %470 }
  0xe9   : > { %1033 = vperm.xlu1 %1724, %v1930_v3   ;;  %v586_v16 = vpop.permute.xlu1 %585  ;;  %v494_v3 = vmul.f32 %v2129_v0, %v455_v47  ;;  %v497_v47 = vmul.f32 %v2132_v11, %v2122_v61 }
  0xea   : > { %v610_v49 = vadd.f32 %v586_v16, %v562_v20  ;;  %v611_v42 = vadd.f32 %v586_v16, %v563_v40  ;;  %v496_v20 = vmul.f32 %v2129_v0, %v2122_v61 }
  0xeb   : > { %v510_v41 = vadd.f32 %v494_v3, %v435_v34  ;;  %v513_v3 = vadd.f32 %v497_v47, %v438_v9  ;;  %v719_v47 = vmul.f32 %v2100_v53, %v2051_v31 }
  0xec   : > { %v674_v62 = vadd.f32 %v658_v13, %v610_v49  ;;  %v675_v4 = vadd.f32 %v659_v24, %v611_v42  ;;  %v2175_v18 = vpop.permute.xlu0 %474  ;;  %v608_v24 = vadd.f32 %v582_v14, %v560_v37  ;;  %v512_v61 = vadd.f32 %v496_v20, %v437_v35 }
  0xed   : > { %1726 = vset.pattern.permute.xlu1 %v1821_v10  ;;  %v558_v10 = vmul.f32 %v2091_v50, %v2048_v30  ;;  %vm846_vm12 = vcmp.ge.f32.partialorder %v510_v41, 0.0 }
  0xee   : > { %vm866_vm7 = vcmp.ge.f32.partialorder %v674_v62, 0.0  ;;  %vm867_vm8 = vcmp.ge.f32.partialorder %v675_v4, 0.0  ;;  %478 = vperm.xlu1 %1726, %v1942_v7   ;;  %v626_v40 = vpop.permute.xlu1 %625  ;;  %v511_v62 = vadd.f32 %v495_v19, %v436_v23  ;;  %v609_v4 = vadd.f32 %v582_v14, %v561_v22 }
  0xef   : > { %vm2191_vm10 = vmand %vm850_vm6, %vm866_vm7  ;;  %v654_v16 = vmul.f32 %v626_v40, %v2129_v0  ;;  %v655_v50 = vmul.f32 %v626_v40, %v2132_v11  ;;  %vm848_vm3 = vcmp.ge.f32.partialorder %v512_v61, 0.0  ;;  %vm849_vm7 = vcmp.ge.f32.partialorder %v513_v3, 0.0 }
  0xf0   : > { %vm2202_vm11 = vmand %vm851_vm9, %vm867_vm8  ;;  %vm847_vm15 = vcmp.ge.f32.partialorder %v511_v62, 0.0  ;;  %v718_v22 = vmul.f32 %v2100_v53, %v2048_v30  ;;  %v723_v62 = vmul.f32 %v2111_v57, %v2051_v31  ;;  %v2952_v14 = vmov 9  }
  0xf1   : > { %v578_v39 = vpop.permute.xlu0 %577  ;;  %v2957_v19 = vmov 0 }
  0xf2   : > { %v606_v17 = vadd.f32 %v578_v39, %v558_v10  ;;  %v607_v49 = vadd.f32 %v578_v39, %v559_v36  ;;  %1727 = vset.pattern.permute.xlu1 %v1826_v15  ;;  %v630_v42 = vpop.permute.xlu1 %629  ;;  %v2934_v15 = vmov 5   ;;  %v716_v10 = vmul.f32 %v2102_v54, %v2048_v30 }
  0xf3   : > { %v656_v12 = vmul.f32 %v630_v42, %v2129_v0  ;;  %v657_v52 = vmul.f32 %v630_v42, %v2132_v11  ;;  %597 = vperm.xlu1 %1727, %v1944_v8   ;;  %v717_v36 = vmul.f32 %v2102_v54, %v2051_v31  ;;  %v722_v42 = vmul.f32 %v2111_v57, %v2048_v30 }
  0xf4   : > { %v670_v29 = vadd.f32 %v654_v16, %v606_v17  ;;  %v671_v34 = vadd.f32 %v655_v50, %v607_v49  ;;  %v2941_v16 = vmov 6  }
  0xf5   : > { %v672_v37 = vadd.f32 %v656_v12, %v608_v24  ;;  %v673_v21 = vadd.f32 %v657_v52, %v609_v4  ;;  %v2216_v40 = vpop.permute.xlu0 %589  ;;  %v2942_v52 = vmov 8  }
  0xf6   : > { %vm862_vm13 = vcmp.ge.f32.partialorder %v670_v29, 0.0  ;;  %vm863_vm14 = vcmp.ge.f32.partialorder %v671_v34, 0.0 }
  0xf7   : > { %vm2218_vm0 = vmand %vm846_vm12, %vm862_vm13  ;;  %vm864_vm1 = vcmp.ge.f32.partialorder %v672_v37, 0.0  ;;  %vm865_vm2 = vcmp.ge.f32.partialorder %v673_v21, 0.0  ;;  %1729 = vset.pattern.permute.xlu1 %v2934_v15  ;;  %v2223_v23 = vpop.permute.xlu1 %701  ;;  %v2943_v37 = vmov 10   ;;  %v2961_v21 = vmov 11  }
  0xf8   : > { %vm2225_vm6 = vmand %vm847_vm15, %vm863_vm14  ;;  %645 = vperm.xlu1 %1729, %v1944_v8  }
  0xf9   : > { %vm2230_vm8 = vmand %vm848_vm3, %vm864_vm1  ;;  %v2234_v9 = vpop.permute.xlu0 %601 }
  0xfa   : > { %vm2236_vm9 = vmand %vm849_vm7, %vm865_vm2 }
  0xfc   : > { %649 = vperm.xlu1 %1729, %v1942_v7   ;;  %v734_v20 = vpop.permute.xlu1 %733 }
  0xfd   : > { %v764_v41 = vadd.f32 %v734_v20, %v716_v10  ;;  %v765_v24 = vadd.f32 %v734_v20, %v717_v36 }
  0xfe   : > { %v742_v39 = vpop.permute.xlu0 %741 }
 0x100   : > { %1731 = vset.pattern.permute.xlu1 %v2941_v16  ;;  %v738_v50 = vpop.permute.xlu1 %737 }
 0x101   : > { %v766_v17 = vadd.f32 %v738_v50, %v718_v22  ;;  %v767_v49 = vadd.f32 %v738_v50, %v719_v47  ;;  %761 = vperm.xlu1 %1731, %v1942_v7   ;;  %v720_v22 = vmul.f32 %v2108_v56, %v2048_v30  ;;  %v721_v47 = vmul.f32 %v2108_v56, %v2051_v31 }
 0x102   : > { %v2251_v54 = vpop.permute.xlu0 %749  ;;  %v2946_v56 = vmov 0 }
 0x104   : > { %v746_v4 = vpop.permute.xlu1 %745 }
 0x105   : > { %v770_v53 = vadd.f32 %v746_v4, %v722_v42  ;;  %v771_v12 = vadd.f32 %v746_v4, %v723_v62  ;;  %1732 = vset.pattern.permute.xlu1 %v2942_v52  ;;  %v768_v62 = vadd.f32 %v742_v39, %v720_v22  ;;  %v769_v4 = vadd.f32 %v742_v39, %v721_v47 }
 0x106   : > { %805 = vperm.xlu1 %1732, %v1944_v8   ;;  %v2259_v61 = vpop.permute.xlu0 %757 }
 0x109   : > { %v782_v29 = vpop.permute.xlu1 %781 }
 0x10a   : > { %v812_v34 = vmul.f32 %v782_v29, %v2129_v0  ;;  %v813_v3 = vmul.f32 %v782_v29, %v2132_v11  ;;  %1734 = vset.pattern.permute.xlu1 %v2943_v37  ;;  %v2950_v29 = vmov 0 }
 0x10b   : > { %949 = vperm.xlu1 %1734, %v1944_v8   ;;  %v786_v15 = vpop.permute.xlu0 %785 }
 0x10c   : > { %v828_v57 = vadd.f32 %v812_v34, %v764_v41  ;;  %v829_v10 = vadd.f32 %v813_v3, %v765_v24  ;;  %v814_v36 = vmul.f32 %v786_v15, %v2129_v0  ;;  %v815_v20 = vmul.f32 %v786_v15, %v2132_v11 }
 0x10d   : > { %v790_v16 = vpop.permute.xlu1 %789  ;;  %v2944_v41 = vmov 0  ;;  %v2953_v3 = vmov 0  ;;  %v2955_v15 = vmov 0 }
 0x10e   : > { %vm892_vm12 = vcmp.ge.f32.partialorder %v828_v57, 0.0  ;;  %vm893_vm13 = vcmp.ge.f32.partialorder %v829_v10, 0.0  ;;  %v830_v50 = vadd.f32 %v814_v36, %v766_v17  ;;  %v831_v42 = vadd.f32 %v815_v20, %v767_v49 }
 0x10f   : > { %vm2273_vm14 = vmand %vm2158_vm4, %vm892_vm12  ;;  %v816_v24 = vmul.f32 %v790_v16, %v2129_v0  ;;  %v817_v52 = vmul.f32 %v790_v16, %v2132_v11  ;;  %953 = vperm.xlu1 %1734, %v1942_v7   ;;  %v442_v36 = vadd.f32 %v2076_v43, %v394_v48 }
 0x110   : > { %v2945_v41 = vsel %vm2273_vm14, 4294967295, %v2944_v41  ;;  %vm2282_vm15 = vmand %vm2164_vm5, %vm893_vm13  ;;  %vm894_vm1 = vcmp.ge.f32.partialorder %v830_v50, 0.0  ;;  %vm895_vm2 = vcmp.ge.f32.partialorder %v831_v42, 0.0  ;;  %v502_v50 = vmul.f32 %v2129_v0, %v2168_v1 }
 0x111   : > { %v2947_v56 = vsel %vm2282_vm15, 4294967295, %v2946_v56  ;;  %vm2288_vm4 = vmand %vm2218_vm0, %vm894_vm1  ;;  %v832_v39 = vadd.f32 %v816_v24, %v768_v62  ;;  %v833_v17 = vadd.f32 %v817_v52, %v769_v4  ;;  %v794_v49 = vpop.permute.xlu1 %793  ;;  %v503_v42 = vmul.f32 %v2132_v11, %v2168_v1 }
 0x112   : > { %v2949_v2 = vsel %vm2288_vm4, 4294967295, %v2948_v2  ;;  %vm2294_vm3 = vmand %vm2225_vm6, %vm895_vm2  ;;  %v818_v38 = vmul.f32 %v794_v49, %v2129_v0  ;;  %v819_v34 = vmul.f32 %v794_v49, %v2132_v11  ;;  %v567_v24 = vmul.f32 %v2141_v60, %v2051_v31 }
 0x113   : > { %v2951_v29 = vsel %vm2294_vm3, 4294967295, %v2950_v29  ;;  %vm896_vm5 = vcmp.ge.f32.partialorder %v832_v39, 0.0  ;;  %vm897_vm7 = vcmp.ge.f32.partialorder %v833_v17, 0.0  ;;  %1736 = vset.pattern.permute.xlu1 %v2952_v14  ;;  %v662_v52 = vmul.f32 %v2147_v63, %v2129_v0 }
 0x114   : > { %vm2303_vm0 = vmand %vm2230_vm8, %vm896_vm5  ;;  %v834_v37 = vadd.f32 %v818_v38, %v770_v53  ;;  %v835_v35 = vadd.f32 %v819_v34, %v771_v12  ;;  %993 = vperm.xlu1 %1736, %v1936_v5   ;;  %v2959_v5 = vmov 0  ;;  %v393_v12 = vmul.f32 %v2048_v30, %v2040_v28 }
 0x115   : > { %v2954_v3 = vsel %vm2303_vm0, 4294967295, %v2953_v3  ;;  %vm2310_vm6 = vmand %vm2236_vm9, %vm897_vm7  ;;  %v395_v28 = vmul.f32 %v2048_v30, %v2038_v27  ;;  %v565_v34 = vmul.f32 %v2094_v51, %v2051_v31 }
 0x116   : > { %v2956_v15 = vsel %vm2310_vm6, 4294967295, %v2955_v15  ;;  %vm898_vm12 = vcmp.ge.f32.partialorder %v834_v37, 0.0  ;;  %vm899_vm13 = vcmp.ge.f32.partialorder %v835_v35, 0.0  ;;  %v2314_v57 = vpop.permute.xlu1 %929  ;;  %v441_v10 = vadd.f32 %v2076_v43, %v393_v12 }
 0x117   : > { %vm2318_vm8 = vmand %vm2191_vm10, %vm898_vm12  ;;  %v396_v43 = vmul.f32 %v2051_v31, %v2038_v27  ;;  %v443_v62 = vadd.f32 %v2078_v44, %v395_v28  ;;  %v663_v27 = vmul.f32 %v2147_v63, %v2132_v11  ;;  %v613_v35 = vadd.f32 %v2216_v40, %v565_v34 }
 0x118   : > { %v2958_v19 = vsel %vm2318_vm8, 4294967295, %v2957_v19  ;;  %vm2324_vm1 = vmand %vm2202_vm11, %vm899_vm13  ;;  %1737 = vset.pattern.permute.xlu1 %v2961_v21 }
 0x119   : > { %v2960_v5 = vsel %vm2324_vm1, 4294967295, %v2959_v5  ;;  %1037 = vperm.xlu1 %1737, %v1938_v6   ;;  %v444_v4 = vadd.f32 %v2078_v44, %v396_v43  ;;  %v518_v17 = vadd.f32 %v502_v50, %v443_v62  ;;  %v564_v44 = vmul.f32 %v2094_v51, %v2048_v30 }
 0x11a   : > { %v2330_v53 = vpop.permute.xlu1 %933  ;;  %v2971_v50 = vmov 0  ;;  %v727_v62 = vmul.f32 %v2105_v55, %v2051_v31 }
 0x11b   : > { %v519_v49 = vadd.f32 %v503_v42, %v444_v4  ;;  %vm854_vm10 = vcmp.ge.f32.partialorder %v518_v17, 0.0  ;;  %v612_v63 = vadd.f32 %v2216_v40, %v564_v44  ;;  %v726_v42 = vmul.f32 %v2105_v55, %v2048_v30 }
 0x11d   : > { %1738 = vset.pattern.permute.xlu1 %v2952_v14  ;;  %vm855_vm11 = vcmp.ge.f32.partialorder %v519_v49, 0.0 }
 0x11e   : > { %997 = vperm.xlu1 %1738, %v1944_v8  }
 0x11f   : > { %v467_v13 = vpop.permute.xlu1 %466 }
 0x120   : > { %v500_v20 = vmul.f32 %v2129_v0, %v467_v13  ;;  %v501_v6 = vmul.f32 %v2132_v11, %v467_v13 }
 0x122   : > { %v516_v22 = vadd.f32 %v500_v20, %v441_v10  ;;  %v517_v47 = vadd.f32 %v501_v6, %v442_v36  ;;  %1001 = vperm.xlu1 %1738, %v1942_v7   ;;  %v802_v36 = vpop.permute.xlu0 %801  ;;  %v959_v20 = vmul.f32 %v2314_v57, %v2051_v31 }
 0x123   : > { %v822_v4 = vmul.f32 %v802_v36, %v2129_v0 }
 0x124   : > { %v2343_v16 = vpop.permute.xlu1 %549  ;;  %vm852_vm12 = vcmp.ge.f32.partialorder %v516_v22, 0.0  ;;  %v2970_v22 = vlaneseq }
 0x126   : > { %1739 = vset.pattern.permute.xlu1 %v2961_v21  ;;  %v2396_v43 = vpop.permute.xlu0 %809  ;;  %v1832_v21 = vmov 0.0  }
 0x127   : > { %1049 = vperm.xlu1 %1739, %v1942_v7   ;;  %v566_v7 = vmul.f32 %v2141_v60, %v2048_v30  ;;  %1261 = vmatprep.mubr.f32.mxu0 %v1832_v21  ;;  %315 = vst [vmem:[%s2442_s26] sm:$0x77] %v1832_v21 }
 0x128   : > { %v2347_v8 = vpop.permute.xlu1 %553  ;;  %1267 = vmatprep.mubr.f32.mxu1 %v1832_v21  ;;  %v962_v21 = vmul.f32 %v2116_v59, %v2048_v30 }
 0x12d   : > { %v594_v39 = vpop.permute.xlu1 %593 }
 0x12e   : > { %v614_v1 = vadd.f32 %v594_v39, %v566_v7  ;;  %v615_v38 = vadd.f32 %v594_v39, %v567_v24  ;;  %v823_v7 = vmul.f32 %v802_v36, %v2132_v11  ;;  %v974_v39 = vpop.permute.xlu0 %973 }
 0x130   : > { %v678_v14 = vadd.f32 %v662_v52, %v614_v1  ;;  %v679_v37 = vadd.f32 %v663_v27, %v615_v38  ;;  %v724_v1 = vmul.f32 %v2223_v23, %v2048_v30  ;;  %v725_v38 = vmul.f32 %v2223_v23, %v2051_v31 }
 0x132   : > { %vm870_vm9 = vcmp.ge.f32.partialorder %v678_v14, 0.0  ;;  %vm871_vm2 = vcmp.ge.f32.partialorder %v679_v37, 0.0  ;;  %v638_v60 = vpop.permute.xlu1 %637  ;;  %v772_v44 = vadd.f32 %v2251_v54, %v724_v1  ;;  %v773_v34 = vadd.f32 %v2251_v54, %v725_v38 }
 0x133   : > { %vm2373_vm5 = vmand %vm854_vm10, %vm870_vm9  ;;  %v660_v12 = vmul.f32 %v638_v60, %v2129_v0  ;;  %v661_v51 = vmul.f32 %v638_v60, %v2132_v11  ;;  %vm853_vm10 = vcmp.ge.f32.partialorder %v517_v47, 0.0  ;;  %v1831_v47 = vmov 1e+10  }
 0x134   : > { %vm2379_vm7 = vmand %vm855_vm11, %vm871_vm2  ;;  %vm2401_vm11 = vcmp.lt.s32.totalorder %v2970_v22, 256  ;;  %v958_v22 = vmul.f32 %v2314_v57, %v2048_v30  ;;  %v956_v57 = vmul.f32 %v2113_v58, %v2048_v30 }
 0x135   : > { %v676_v13 = vadd.f32 %v660_v12, %v612_v63  ;;  %v677_v10 = vadd.f32 %v661_v51, %v613_v35  ;;  %v2972_v50 = vsel %vm2401_vm11, 4294967295, %v2971_v50  ;;  %320 = vst.msk [vmem:[%s2405_s14] sm:$0x3] %vm2401_vm11, %v1831_v47  ;;  %v986_v63 = vpop.permute.xlu0 %985  ;;  %v2977_v51 = vmov 0 }
 0x136   : > { %v1004_v38 = vadd.f32 %v974_v39, %v956_v57 }
 0x137   : > { %vm868_vm13 = vcmp.ge.f32.partialorder %v676_v13, 0.0  ;;  %vm869_vm1 = vcmp.ge.f32.partialorder %v677_v10, 0.0  ;;  %v2383_v40 = vpop.permute.xlu1 %709 }
 0x138   : > { %vm2385_vm9 = vmand %vm852_vm12, %vm868_vm13 }
 0x139   : > { %vm2389_vm8 = vmand %vm853_vm10, %vm869_vm1  ;;  %v2450_v48 = vpop.permute.xlu0 %989 }
 0x13b   : > { %v2394_v28 = vpop.permute.xlu1 %713 }
 0x13d   : > { %v1026_v36 = vpop.permute.xlu0 %1025 }
 0x13e   : > { %v1054_v47 = vmul.f32 %v1026_v36, %v2129_v0 }
 0x140   : > { %v754_v24 = vpop.permute.xlu1 %753 }
 0x141   : > { %v774_v52 = vadd.f32 %v754_v24, %v726_v42  ;;  %v775_v27 = vadd.f32 %v754_v24, %v727_v62  ;;  %v1055_v42 = vmul.f32 %v1026_v36, %v2132_v11 }
 0x143   : > { %v838_v17 = vadd.f32 %v822_v4, %v774_v52  ;;  %v839_v49 = vadd.f32 %v823_v7, %v775_v27 }
 0x145   : > { %vm902_vm1 = vcmp.ge.f32.partialorder %v838_v17, 0.0  ;;  %vm903_vm2 = vcmp.ge.f32.partialorder %v839_v49, 0.0  ;;  %v798_v55 = vpop.permute.xlu1 %797  ;;  %v957_v49 = vmul.f32 %v2113_v58, %v2051_v31  ;;  %v963_v58 = vmul.f32 %v2116_v59, %v2051_v31 }
 0x146   : > { %vm2424_vm12 = vmand %vm2373_vm5, %vm902_vm1  ;;  %v820_v37 = vmul.f32 %v798_v55, %v2129_v0  ;;  %v821_v60 = vmul.f32 %v798_v55, %v2132_v11 }
 0x147   : > { %vm2432_vm13 = vmand %vm2379_vm7, %vm903_vm2  ;;  %v1005_v55 = vadd.f32 %v974_v39, %v957_v49 }
 0x148   : > { %v836_v35 = vadd.f32 %v820_v37, %v772_v44  ;;  %v837_v12 = vadd.f32 %v821_v60, %v773_v34  ;;  %v960_v37 = vmul.f32 %v2330_v53, %v2048_v30  ;;  %v961_v60 = vmul.f32 %v2330_v53, %v2051_v31 }
 0x14a   : > { %vm900_vm10 = vcmp.ge.f32.partialorder %v836_v35, 0.0  ;;  %vm901_vm11 = vcmp.ge.f32.partialorder %v837_v12, 0.0  ;;  %v2437_v54 = vpop.permute.xlu1 %941 }
 0x14b   : > { %vm2446_vm5 = vmand %vm2385_vm9, %vm900_vm10  ;;  %vm2982_vm9 = vnez %v2960_v5 }
 0x14c   : > { %v2978_v51 = vsel %vm2446_vm5, 4294967295, %v2977_v51  ;;  %vm2455_vm7 = vmand %vm2389_vm8, %vm901_vm11  ;;  %vm2981_vm8 = vnez %v2958_v19 }
 0x14e   : > { %v2459_v10 = vpop.permute.xlu1 %945 }
 0x153   : > { %v978_v62 = vpop.permute.xlu1 %977 }
 0x154   : > { %v1006_v4 = vadd.f32 %v978_v62, %v958_v22  ;;  %v1007_v6 = vadd.f32 %v978_v62, %v959_v20 }
 0x156   : > { %v1070_v7 = vadd.f32 %v1054_v47, %v1006_v4  ;;  %v1071_v24 = vadd.f32 %v1055_v42, %v1007_v6  ;;  %v1010_v6 = vadd.f32 %v986_v63, %v962_v21  ;;  %v398_v21 = vmul.f32 %v2051_v31, %v2055_v33 }
 0x157   : > { %v982_v52 = vpop.permute.xlu1 %981 }
 0x158   : > { %v2469_v27 = vsel %vm2288_vm4, %v1070_v7, 1e+10  ;;  %v2473_v17 = vsel %vm2294_vm3, %v1071_v24, 1e+10  ;;  %v1008_v36 = vadd.f32 %v982_v52, %v960_v37  ;;  %v1009_v39 = vadd.f32 %v982_v52, %v961_v60 }
 0x159   : > { %v1011_v7 = vadd.f32 %v986_v63, %v963_v58 }
 0x15c   : > { %v1022_v1 = vpop.permute.xlu1 %1021 }
 0x15d   : > { %v1052_v44 = vmul.f32 %v1022_v1, %v2129_v0  ;;  %v1053_v34 = vmul.f32 %v1022_v1, %v2132_v11 }
 0x15f   : > { %v1068_v35 = vadd.f32 %v1052_v44, %v1004_v38  ;;  %v1069_v12 = vadd.f32 %v1053_v34, %v1005_v55 }
 0x160   : > { %v1030_v22 = vpop.permute.xlu1 %1029 }
 0x161   : > { %v2491_v20 = vsel %vm2273_vm14, %v1068_v35, 1e+10  ;;  %v2495_v47 = vsel %vm2282_vm15, %v1069_v12, 1e+10  ;;  %v1056_v53 = vmul.f32 %v1030_v22, %v2129_v0  ;;  %v1057_v42 = vmul.f32 %v1030_v22, %v2132_v11 }
 0x162   : > { %v397_v12 = vmul.f32 %v2048_v30, %v2055_v33  ;;  %v568_v33 = vmul.f32 %v2343_v16, %v2048_v30 }
 0x163   : > { %v1072_v62 = vadd.f32 %v1056_v53, %v1008_v36  ;;  %v1073_v4 = vadd.f32 %v1057_v42, %v1009_v39  ;;  %v504_v36 = vmul.f32 %v2129_v0, %v2175_v18  ;;  %v399_v39 = vmul.f32 %v2048_v30, %v2053_v32 }
 0x164   : > { %v1034_v59 = vpop.permute.xlu1 %1033  ;;  %v445_v22 = vadd.f32 %v2083_v45, %v397_v12  ;;  %v505_v53 = vmul.f32 %v2132_v11, %v2175_v18  ;;  %v400_v42 = vmul.f32 %v2051_v31, %v2053_v32 }
 0x165   : > { %v2501_v24 = vsel %vm2303_vm0, %v1072_v62, 1e+10  ;;  %v2505_v52 = vsel %vm2310_vm6, %v1073_v4, 1e+10  ;;  %v1058_v57 = vmul.f32 %v1034_v59, %v2129_v0  ;;  %v1059_v49 = vmul.f32 %v1034_v59, %v2132_v11 }
 0x166   : > { %v1100_v1 = vmin.f32 %v2491_v20, %v2501_v24  ;;  %v446_v62 = vadd.f32 %v2083_v45, %v398_v21  ;;  %v569_v4 = vmul.f32 %v2343_v16, %v2051_v31  ;;  %v571_v59 = vmul.f32 %v2347_v8, %v2051_v31 }
 0x167   : > { %v1074_v63 = vadd.f32 %v1058_v57, %v1010_v6  ;;  %v1075_v55 = vadd.f32 %v1059_v49, %v1011_v7  ;;  %v520_v6 = vadd.f32 %v504_v36, %v445_v22  ;;  %v570_v7 = vmul.f32 %v2347_v8, %v2048_v30 }
 0x168   : > { %v521_v12 = vadd.f32 %v505_v53, %v446_v62  ;;  %v447_v21 = vadd.f32 %v2085_v46, %v399_v39  ;;  %v619_v38 = vadd.f32 %v2234_v9, %v571_v59  ;;  %v730_v62 = vmul.f32 %v2394_v28, %v2048_v30 }
 0x169   : > { %v2515_v44 = vsel %vm2981_vm8, %v1074_v63, 1e+10  ;;  %v2519_v34 = vsel %vm2982_vm9, %v1075_v55, 1e+10  ;;  %v479_v37 = vpop.permute.xlu1 %478  ;;  %v448_v55 = vadd.f32 %v2085_v46, %v400_v42  ;;  %vm856_vm11 = vcmp.ge.f32.partialorder %v520_v6, 0.0 }
 0x16a   : > { %v1101_v60 = vmin.f32 %v2469_v27, %v2515_v44  ;;  %v1114_v35 = vmin.f32 %v2473_v17, %v2519_v34  ;;  %v507_v18 = vmul.f32 %v2132_v11, %v479_v37  ;;  %v506_v16 = vmul.f32 %v2129_v0, %v479_v37 }
 0x16b   : > { %v618_v8 = vadd.f32 %v2234_v9, %v570_v7  ;;  %vm857_vm10 = vcmp.ge.f32.partialorder %v521_v12, 0.0  ;;  %v731_v6 = vmul.f32 %v2394_v28, %v2051_v31  ;;  %v826_v7 = vmul.f32 %v2396_v43, %v2129_v0 }
 0x16c   : > { %v522_v53 = vadd.f32 %v506_v16, %v447_v21  ;;  %v827_v59 = vmul.f32 %v2396_v43, %v2132_v11  ;;  %v729_v28 = vmul.f32 %v2383_v40, %v2051_v31  ;;  %v964_v46 = vmul.f32 %v2437_v54, %v2048_v30 }
 0x16e   : > { %v598_v58 = vpop.permute.xlu1 %597 }
 0x16f   : > { %v616_v49 = vadd.f32 %v598_v58, %v568_v33  ;;  %v617_v32 = vadd.f32 %v598_v58, %v569_v4  ;;  %v523_v33 = vadd.f32 %v507_v18, %v448_v55  ;;  %v777_v55 = vadd.f32 %v2259_v61, %v729_v28 }
 0x173   : > { %v646_v57 = vpop.permute.xlu1 %645 }
 0x174   : > { %v664_v45 = vmul.f32 %v646_v57, %v2129_v0  ;;  %v665_v63 = vmul.f32 %v646_v57, %v2132_v11 }
 0x176   : > { %v680_v36 = vadd.f32 %v664_v45, %v616_v49  ;;  %v681_v22 = vadd.f32 %v665_v63, %v617_v32 }
 0x177   : > { %v650_v58 = vpop.permute.xlu1 %649 }
 0x178   : > { %vm872_vm1 = vcmp.ge.f32.partialorder %v680_v36, 0.0  ;;  %vm873_vm2 = vcmp.ge.f32.partialorder %v681_v22, 0.0  ;;  %v666_v4 = vmul.f32 %v650_v58, %v2129_v0  ;;  %v667_v42 = vmul.f32 %v650_v58, %v2132_v11 }
 0x179   : > { %vm2557_vm14 = vmand %vm856_vm11, %vm872_vm1  ;;  %vm859_vm1 = vcmp.ge.f32.partialorder %v523_v33, 0.0 }
 0x17a   : > { %vm2561_vm15 = vmand %vm857_vm10, %vm873_vm2  ;;  %v682_v39 = vadd.f32 %v666_v4, %v618_v8  ;;  %v683_v9 = vadd.f32 %v667_v42, %v619_v38  ;;  %vm858_vm10 = vcmp.ge.f32.partialorder %v522_v53, 0.0  ;;  %v728_v38 = vmul.f32 %v2383_v40, %v2048_v30  ;;  %v1042_v4 = vpop.permute.xlu0 %1041  ;;  %v2996_v40 = vld [vmem:[#allocation5_spill] sm:$0xff] }
 0x17b   : > { %v966_v42 = vmul.f32 %v2459_v10, %v2048_v30  ;;  %v967_v53 = vmul.f32 %v2459_v10, %v2051_v31  ;;  %v1062_v37 = vmul.f32 %v1042_v4, %v2129_v0 }
 0x17c   : > { %vm874_vm11 = vcmp.ge.f32.partialorder %v682_v39, 0.0  ;;  %v762_v18 = vpop.permute.xlu1 %761  ;;  %vm875_vm2 = vcmp.ge.f32.partialorder %v683_v9, 0.0  ;;  %v776_v43 = vadd.f32 %v2259_v61, %v728_v38  ;;  %v1063_v39 = vmul.f32 %v1042_v4, %v2132_v11 }
 0x17d   : > { %v778_v57 = vadd.f32 %v762_v18, %v730_v62  ;;  %v779_v49 = vadd.f32 %v762_v18, %v731_v6  ;;  %vm891_vm4 = vmand %vm859_vm1, %vm875_vm2  ;;  %v965_v62 = vmul.f32 %v2437_v54, %v2051_v31 }
 0x17e   : > { %vm890_vm3 = vmand %vm858_vm10, %vm874_vm11 }
 0x17f   : > { %v842_v32 = vadd.f32 %v826_v7, %v778_v57  ;;  %v843_v45 = vadd.f32 %v827_v59, %v779_v49  ;;  %v1012_v57 = vadd.f32 %v2450_v48, %v964_v46  ;;  %v1013_v49 = vadd.f32 %v2450_v48, %v965_v62 }
 0x181   : > { %v806_v63 = vpop.permute.xlu1 %805  ;;  %vm907_vm0 = vcmp.ge.f32.partialorder %v843_v45, 0.0  ;;  %vm906_vm6 = vcmp.ge.f32.partialorder %v842_v32, 0.0  ;;  %v1046_v45 = vpop.permute.xlu0 %1045 }
 0x182   : > { %v824_v12 = vmul.f32 %v806_v63, %v2129_v0  ;;  %v825_v16 = vmul.f32 %v806_v63, %v2132_v11  ;;  %vm2581_vm1 = vmand %vm891_vm4, %vm907_vm0 }
 0x183   : > { %vm2585_vm2 = vmand %vm890_vm3, %vm906_vm6 }
 0x184   : > { %v840_v36 = vadd.f32 %v824_v12, %v776_v43  ;;  %v841_v22 = vadd.f32 %v825_v16, %v777_v55 }
 0x186   : > { %vm904_vm11 = vcmp.ge.f32.partialorder %v840_v36, 0.0  ;;  %vm905_vm10 = vcmp.ge.f32.partialorder %v841_v22, 0.0  ;;  %v950_v8 = vpop.permute.xlu1 %949  ;;  %v1064_v36 = vmul.f32 %v1046_v45, %v2129_v0  ;;  %v1065_v22 = vmul.f32 %v1046_v45, %v2132_v11 }
 0x187   : > { %vm2591_vm8 = vmand %vm2557_vm14, %vm904_vm11  ;;  %v968_v12 = vmul.f32 %v950_v8, %v2048_v30  ;;  %v969_v16 = vmul.f32 %v950_v8, %v2051_v31  ;;  %v2995_v8 = vmin.f32 %v2495_v47, %v2505_v52 }
 0x188   : > { %vm2597_vm4 = vmand %vm2561_vm15, %vm905_vm10 }
 0x18a   : > { %v954_v58 = vpop.permute.xlu1 %953 }
 0x18f   : > { %v994_v9 = vpop.permute.xlu1 %993 }
 0x190   : > { %v1014_v6 = vadd.f32 %v994_v9, %v966_v42  ;;  %v1015_v7 = vadd.f32 %v994_v9, %v967_v53 }
 0x192   : > { %v1078_v59 = vadd.f32 %v1062_v37, %v1014_v6  ;;  %v1079_v18 = vadd.f32 %v1063_v39, %v1015_v7 }
 0x194   : > { %v2615_v10 = vsel %vm2424_vm12, %v1078_v59, 1e+10  ;;  %v2619_v38 = vsel %vm2432_vm13, %v1079_v18, 1e+10  ;;  %v1038_v28 = vpop.permute.xlu1 %1037 }
 0x195   : > { %v1060_v32 = vmul.f32 %v1038_v28, %v2129_v0  ;;  %v1061_v54 = vmul.f32 %v1038_v28, %v2132_v11  ;;  %v1116_v63 = vmin.f32 %v1114_v35, %v2619_v38  ;;  %v1103_v48 = vmin.f32 %v1101_v60, %v2615_v10 }
 0x197   : > { %v1076_v43 = vadd.f32 %v1060_v32, %v1012_v57  ;;  %v1077_v55 = vadd.f32 %v1061_v54, %v1013_v49  ;;  %v971_v57 = vmul.f32 %v954_v58, %v2051_v31 }
 0x199   : > { %v2637_v4 = vsel %vm2446_vm5, %v1076_v43, 1e+10  ;;  %v2641_v35 = vsel %vm2455_vm7, %v1077_v55, 1e+10  ;;  %v998_v42 = vpop.permute.xlu1 %997 }
 0x19a   : > { %v1102_v60 = vmin.f32 %v1100_v1, %v2637_v4  ;;  %v1115_v53 = vmin.f32 %v2995_v8, %v2641_v35  ;;  %v1016_v37 = vadd.f32 %v998_v42, %v968_v12  ;;  %v1017_v39 = vadd.f32 %v998_v42, %v969_v16 }
 0x19b   : > { %v970_v1 = vmul.f32 %v954_v58, %v2048_v30 }
 0x19c   : > { %v1080_v9 = vadd.f32 %v1064_v36, %v1016_v37  ;;  %v1081_v46 = vadd.f32 %v1065_v22, %v1017_v39 }
 0x19d   : > { %v1002_v62 = vpop.permute.xlu1 %1001 }
 0x19e   : > { %v1096_v6 = vsel %vm2591_vm8, %v1080_v9, 1e+10  ;;  %v1097_v7 = vsel %vm2597_vm4, %v1081_v46, 1e+10  ;;  %v1018_v28 = vadd.f32 %v1002_v62, %v970_v1  ;;  %v1019_v32 = vadd.f32 %v1002_v62, %v971_v57 }
 0x19f   : > { %v1104_v59 = vmin.f32 %v1102_v60, %v1096_v6  ;;  %v1117_v18 = vmin.f32 %v1115_v53, %v1097_v7  ;;  %v1833_v1 = vmov 1966171168  }
 0x1a0   : > { %v1323_v57 = vunpack.c.l.s4 %v1833_v1 }
 0x1a2   : > { %v1050_v49 = vpop.permute.xlu1 %1049 }
 0x1a3   : > { %v1066_v54 = vmul.f32 %v1050_v49, %v2129_v0  ;;  %v1067_v45 = vmul.f32 %v1050_v49, %v2132_v11 }
 0x1a5   : > { %v1082_v43 = vadd.f32 %v1066_v54, %v1018_v28  ;;  %v1083_v55 = vadd.f32 %v1067_v45, %v1019_v32  ;;  %v1303_v32 = vld [vmem:[%s2405_s14] sm:$0x3] }
 0x1a7   : > { %v1099_v12 = vsel %vm2581_vm1, %v1083_v55, 1e+10  ;;  %v1098_v16 = vsel %vm2585_vm2, %v1082_v43, 1e+10 }
 0x1a8   : > { %v1118_v36 = vmin.f32 %v1116_v63, %v1099_v12  ;;  %v1105_v22 = vmin.f32 %v1103_v48, %v1098_v16  ;;  %v2669_v48 = vrot.slane %v1303_v32, %v2033_v25 }
 0x1aa   : > { %v1119_v42 = vmin.f32 %v1117_v18, %v1118_v36  ;;  %v1106_v58 = vmin.f32 %v1104_v59, %v1105_v22  ;;  %v2672_v59 = vrot.slane %v1303_v32, %v2036_v26  ;;  %v1324_v18 = vunpack.c.0.s8 %v1323_v57 }
 0x1ab   : > { %v1834_v26 = vmov 1.0  }
 0x1ac   : > { %v1120_v60 = vrot.slane %v1119_v42, 4  ;;  %v1107_v8 = vrot.slane %v1106_v58, 4  ;;  %v1327_v61 = vsub.s32 %v1324_v18, %v2996_v40 }
 0x1ae   : > { %v1121_v53 = vmin.f32 %v1119_v42, %v1120_v60  ;;  %v1108_v37 = vmin.f32 %v1106_v58, %v1107_v8 }
 0x1b0   : > { %v1122_v39 = vrot.slane %v1121_v53, 2  ;;  %v1109_v9 = vrot.slane %v1108_v37, 2 }
 0x1b2   : > { %v1123_v46 = vmin.f32 %v1121_v53, %v1122_v39  ;;  %v1110_v62 = vmin.f32 %v1108_v37, %v1109_v9 }
 0x1b4   : > { %v1124_v49 = vrot.slane %v1123_v46, 1  ;;  %v1111_v28 = vrot.slane %v1110_v62, 1 }
 0x1b6   : > { %v2664_v54 = vmin.f32 %v1123_v46, %v1124_v49  ;;  %v2666_v63 = vmin.f32 %v1110_v62, %v1111_v28 }
 0x1b8   : > { %vm1141_vm14 = vcmp.le.f32.partialorder %v1099_v12, %v2664_v54  ;;  %vm1140_vm15 = vcmp.le.f32.partialorder %v1098_v16, %v2666_v63  ;;  %vm1139_vm3 = vcmp.le.f32.partialorder %v1097_v7, %v2664_v54  ;;  %vm1138_vm0 = vcmp.le.f32.partialorder %v1096_v6, %v2666_v63 }
 0x1b9   : > { %vm1157_vm6 = vmand %vm1141_vm14, %vm2581_vm1  ;;  %vm1137_vm11 = vcmp.le.f32.partialorder %v2619_v38, %v2664_v54  ;;  %vm1134_vm5 = vcmp.le.f32.partialorder %v2637_v4, %v2666_v63  ;;  %vm1133_vm14 = vcmp.le.f32.partialorder %v2519_v34, %v2664_v54  ;;  %vm1131_vm9 = vcmp.le.f32.partialorder %v2505_v52, %v2664_v54 }
 0x1ba   : > { %1581 = vmatprep.subr.msk.mxu0 %vm1157_vm6, %v1834_v26  ;;  %1608 = vmatprep.subr.msk.mxu1 %vm1157_vm6, %v1834_v26  ;;  %vm1156_vm1 = vmand %vm1140_vm15, %vm2585_vm2  ;;  %vm1130_vm2 = vcmp.le.f32.partialorder %v2501_v24, %v2666_v63  ;;  %vm1128_vm10 = vcmp.le.f32.partialorder %v2469_v27, %v2666_v63  ;;  %vm1315_vm15 = vcmp.lt.f32.partialorder %v2666_v63, %v2669_v48 }
 0x1bb   : > { %1582 = vmatpush1.msk.msra.mxu0 %vm1156_vm1, %v1834_v26  ;;  %1616 = vmatpush1.msk.msra.mxu1 %vm1156_vm1, %v1834_v26  ;;  %vm1155_vm6 = vmand %vm1139_vm3, %vm2597_vm4  ;;  %vm1127_vm4 = vcmp.le.f32.partialorder %v2495_v47, %v2664_v54  ;;  %vm1126_vm3 = vcmp.le.f32.partialorder %v2491_v20, %v2666_v63  ;;  %v1317_v21 = vsel %vm1315_vm15, %v2666_v63, %v2669_v48 }
 0x1bc   : > { %1583 = vmatprep.subr.msk.mxu0 %vm1155_vm6, %v1834_v26  ;;  %1609 = vmatprep.subr.msk.mxu1 %vm1155_vm6, %v1834_v26  ;;  %vm1154_vm1 = vmand %vm1138_vm0, %vm2591_vm8  ;;  %vm1316_vm8 = vcmp.lt.f32.partialorder %v2664_v54, %v2672_v59 }
 0x1bd   : > { %1584 = vmatpush1.msk.msra.mxu0 %vm1154_vm1, %v1834_v26  ;;  %1617 = vmatpush1.msk.msra.mxu1 %vm1154_vm1, %v1834_v26  ;;  %vm1153_vm6 = vmand %vm1137_vm11, %vm2432_vm13  ;;  %vm2997_vm13 = vcmp.le.f32.partialorder %v2615_v10, %v2666_v63  ;;  %v1318_v23 = vsel %vm1316_vm8, %v2664_v54, %v2672_v59  ;;  %vm2998_vm11 = vcmp.le.f32.partialorder %v2641_v35, %v2664_v54 }
 0x1be   : > { %1585 = vmatprep.subr.msk.mxu0 %vm1153_vm6, %v1834_v26  ;;  %1610 = vmatprep.subr.msk.mxu1 %vm1153_vm6, %v1834_v26  ;;  %vm1152_vm0 = vmand %vm2997_vm13, %vm2424_vm12  ;;  %v1321_v14 = vcombine.low %v1317_v21, %v1318_v23  ;;  %vm2999_vm12 = vnez %v2978_v51  ;;  %vm3000_vm13 = vnez %v2960_v5 }
 0x1bf   : > { %1586 = vmatpush1.msk.msra.mxu0 %vm1152_vm0, %v1834_v26  ;;  %1618 = vmatpush1.msk.msra.mxu1 %vm1152_vm0, %v1834_v26  ;;  %vm1151_vm1 = vmand %vm2998_vm11, %vm2455_vm7  ;;  %vm3001_vm0 = vnez %v2958_v19 }
 0x1c0   : > { %1587 = vmatprep.subr.msk.mxu0 %vm1151_vm1, %v1834_v26  ;;  %1611 = vmatprep.subr.msk.mxu1 %vm1151_vm1, %v1834_v26  ;;  %vm1150_vm6 = vmand %vm1134_vm5, %vm2999_vm12  ;;  %v1328_v13 = vrot.slane %v1321_v14, %v1327_v61  ;;  %vm3002_vm5 = vcmp.le.f32.partialorder %v2515_v44, %v2666_v63  ;;  %vm3003_vm1 = vnez %v2956_v15  ;;  %vm3004_vm12 = vnez %v2954_v3 }
 0x1c1   : > { %1588 = vmatpush1.msk.msra.mxu0 %vm1150_vm6, %v1834_v26  ;;  %1619 = vmatpush1.msk.msra.mxu1 %vm1150_vm6, %v1834_v26  ;;  %vm1149_vm7 = vmand %vm1133_vm14, %vm3000_vm13  ;;  %vm3006_vm13 = vcmp.le.f32.partialorder %v2473_v17, %v2664_v54 }
 0x1c2   : > { %1589 = vmatprep.subr.msk.mxu0 %vm1149_vm7, %v1834_v26  ;;  %1612 = vmatprep.subr.msk.mxu1 %vm1149_vm7, %v1834_v26  ;;  %vm1148_vm11 = vmand %vm3002_vm5, %vm3001_vm0  ;;  %v1335_v5 = vrot.slane %v1328_v13, %v1327_v61  ;;  %vm3007_vm0 = vnez %v2972_v50 }
 0x1c3   : > { %1590 = vmatpush1.msk.msra.mxu0 %vm1148_vm11, %v1834_v26  ;;  %1620 = vmatpush1.msk.msra.mxu1 %vm1148_vm11, %v1834_v26  ;;  %vm1147_vm14 = vmand %vm1131_vm9, %vm3003_vm1  ;;  %vm3005_vm9 = vnez %v2951_v29  ;;  %vm3009_vm11 = vnez %v2947_v56  ;;  %v332_v29 = vld [vmem:[%s299_s6] sm:$0xff] }
 0x1c4   : > { %1591 = vmatprep.subr.msk.mxu0 %vm1147_vm14, %v1834_v26  ;;  %1613 = vmatprep.subr.msk.mxu1 %vm1147_vm14, %v1834_v26  ;;  %vm1146_vm6 = vmand %vm1130_vm2, %vm3004_vm12  ;;  %1341 = vst.msk [vmem:[%s2405_s14] sm:$0x3] %vm3007_vm0, %v1335_v5  ;;  %vm3008_vm2 = vnez %v2949_v2  ;;  %vm1190_vm14 = vcmask 523264   ;;  %v333_v2 = vld [vmem:[%s299_s6 + $0x8] sm:$0xff] }
 0x1c5   : > { %1592 = vmatpush1.msk.msra.mxu0 %vm1146_vm6, %v1834_v26  ;;  %1621 = vmatpush1.msk.msra.mxu1 %vm1146_vm6, %v1834_v26  ;;  %vm1145_vm7 = vmand %vm3006_vm13, %vm3005_vm9 }
 0x1c6   : > { %1593 = vmatprep.subr.msk.mxu0 %vm1145_vm7, %v1834_v26  ;;  %1614 = vmatprep.subr.msk.mxu1 %vm1145_vm7, %v1834_v26  ;;  %vm1144_vm5 = vmand %vm1128_vm10, %vm3008_vm2  ;;  %vm3010_vm10 = vnez %v2945_v41 }
 0x1c7   : > { %1594 = vmatpush1.msk.msra.mxu0 %vm1144_vm5, %v1834_v26  ;;  %1622 = vmatpush1.msk.msra.mxu1 %vm1144_vm5, %v1834_v26  ;;  %vm1143_vm1 = vmand %vm1127_vm4, %vm3009_vm11 }
 0x1c8   : > { %1595 = vmatprep.subr.msk.mxu0 %vm1143_vm1, %v1834_v26  ;;  %1615 = vmatprep.subr.msk.mxu1 %vm1143_vm1, %v1834_v26  ;;  %vm1142_vm12 = vmand %vm1126_vm3, %vm3010_vm10 }
 0x1c9   : > { %1596 = vmatpush1.msk.msra.mxu0 %vm1142_vm12, %v1834_v26  ;;  %1623 = vmatpush1.msk.msra.mxu1 %vm1142_vm12, %v1834_v26 }
 0x1ca   : > { %1597 = vmatmul.mubr.msk.f32.vlgmr.msra.gmra.mxu0 %vm1190_vm14, %v332_v29  ;;  %1598 = vmatmul.mubr.msk.f32.vlgmr.msra.gmra.mxu1 %vm1190_vm14, %v333_v2 }
 0x1cb   : > { %v1368_v56 = vld [vmem:[%s2405_s14] sm:$0x3] }
 0x1cc   : > { %vm1369_vm4 = vcmp.ge.f32.partialorder %v1368_v56, 5e+09 }
 0x1cd   : > { %v1370_v3 = vsel %vm1369_vm4, -1.0, %v1368_v56 }
 0x1ce   : > { %1371 = vst.msk [vmem:[%s2405_s14] sm:$0x3] %vm3007_vm0, %v1370_v3 }
 0x1cf   : > { %1754 = shalt.err (!%p1751_p5)
}
 0x1d0   : > { %s1755_s18 = scalar_lea.hbm %s1400_s10, 32  ;;  %s1759_s29 = scalar_lea.hbm %s2897_s4, 64 }
 0x1d1   : > { %p1756_p6 = scmp.ne.s32.totalorder %s1400_s10, %s1755_s18  ;;  %p1760_p10 = scmp.lt.s32.totalorder %s1400_s10, %s2897_s4 }
 0x1d2   : > { %p1761_p11 = scmp.lt.s32.totalorder %s1759_s29, %s1755_s18 }
 0x1d3   : > { %p1757_p7 = pnand %p1756_p6, %p1901_p4 }
 0x1d4   : > { %p1762_p12 = por %p1761_p11, %p1760_p10 }
 0x1d5   : > { %p1758_p9 = pneg %p1757_p7 }
 0x1d7   : > { %p1763_p13 = pnand %p1762_p12, %p1758_p9 }
 0x1d9   : > { %1766 = shalt.err (!%p1763_p13)
}
 0x1da   : > { %1624 = dma.vmem_to_hbm [thread:$0]  (%p1901_p4), %s1403_s11, 32, %s1400_s10, %s1382_s13   ;;  %vm1292_vm3 = vcmask 1041408   ;;  %v3011_v20 = vmov 0   ;;  %v1342_v33 = vld [vmem:[%s2442_s26] sm:$0x77] }
 0x1db   : > { %v1343_v47 = vsel %vm1315_vm15, 1, %v3011_v20  ;;  %v1344_v24 = vsel %vm1316_vm8, 1, %v3011_v20  ;;  %v1356_v55 = vcombine.high %v1342_v33, %v1342_v33 }
 0x1dc   : > { %v1348_v45 = vrot.slane %v1343_v47, %v2033_v25  ;;  %v1352_v43 = vrot.slane %v1344_v24, %v2033_v25 }
 0x1de   : > { %vm1353_vm15 = vcmp.eq.s32.totalorder %v1348_v45, 1  ;;  %vm1354_vm8 = vcmp.eq.s32.totalorder %v1352_v43, 1 }
 0x28a   : > { %v1263_v41 = vpop.f32.mrf.mxu0  ;;  %v1269_v15 = vpop.f32.mrf.mxu1 }
 0x28b   : > { %v1274_v19 = vmul.f32 %v1263_v41, %v2048_v30  ;;  %v1284_v50 = vmul.f32 %v1263_v41, %v2129_v0  ;;  %v1286_v51 = vmul.f32 %v1269_v15, %v2129_v0 }
 0x28c   : > { %v1265_v27 = vpop.f32.mrf.mxu0  ;;  %v1271_v17 = vpop.f32.mrf.mxu1 }
 0x28d   : > { %v1278_v52 = vrot.slane %v1274_v19, 3  ;;  %v1293_v44 = vrot.slane %v1284_v50, 6  ;;  %v1294_v30 = vrot.slane %v1286_v51, 6  ;;  %v1275_v34 = vmul.f32 %v1265_v27, %v2051_v31 }
 0x28e   : > { %v1285_v0 = vmul.f32 %v1265_v27, %v2132_v11  ;;  %v1287_v10 = vmul.f32 %v1271_v17, %v2132_v11 }
 0x28f   : > { %v1282_v38 = vadd.f32 %v1278_v52, %v1263_v41  ;;  %v1295_v4 = vsel %vm1292_vm3, %v1293_v44, %v1294_v30  ;;  %v1279_v35 = vrot.slane %v1275_v34, 3 }
 0x290   : > { %v1296_v6 = vrot.slane %v1285_v0, 6  ;;  %v1297_v7 = vrot.slane %v1287_v10, 6 }
 0x291   : > { %v1301_v12 = vadd.f32 %v1295_v4, %v1282_v38  ;;  %v1283_v16 = vadd.f32 %v1279_v35, %v1265_v27 }
 0x292   : > { %v1298_v31 = vsel %vm1292_vm3, %v1296_v6, %v1297_v7 }
 0x293   : > { %v1302_v36 = vadd.f32 %v1298_v31, %v1283_v16  ;;  %v1358_v11 = vsel %vm1353_vm15, %v1301_v12, %v1342_v33 }
 0x295   : > { %v1359_v22 = vsel %vm1354_vm8, %v1302_v36, %v1356_v55 }
 0x296   : > { %v1362_v42 = vcombine.low %v1358_v11, %v1359_v22 }
 0x298   : > { %1364 = vst [vmem:[%s2442_s26] sm:$0x77] %v1362_v42 }
 0x299 PF: > { %p1630_p4 = scmp.ge.s32.totalorder %s1817_s20, 2  ;;  %s1426_s25 = sand.u32 1, %s1797_s15  }
 0x29a   : > { %s1427_s7 = scalar_lea.sflag [#allocation3], %s1426_s25 }
 0x29b   : > { %p1627_p0 = pnand %p1630_p4, %p1908_p8 }
 0x29d   : > { %p1628_p1 = pneg %p1627_p0 }
 0x29f   : > { %1792 = dma.done.wait (%p1628_p1), %s1427_s7, 32  }
 0x2a0   : > { %1794 = vsyncadd (%p1628_p1), %s1427_s7, 4294967264  ;;  %s18_s20 = sadd.s32 1, %s1817_s20   ;;  %s3012_s15 = smov %s1801_s16 }
 0x2a1   : > { %p15_p2 = scmp.ge.s32.totalorder %s18_s20, 4   ;;  %s3013_s16 = smov %s1805_s17 }
 0x2a2   : > { %s3014_s17 = smov %s1914_s28  ;;  %s3015_s18 = smov %s1813_s19 }
 0x2a3   : > { %s3016_s19 = smov %s3018_s23  ;;  %17 = sbr.rel (!%p15_p2) target bundleno = 4 (0x4), region = 94 }
 0x2a8   :  { %1432 = vsyncpa [#allocation3], 1 }
 0x2a9   :  { %1434 = vsyncpa [#allocation3 + $0x1], 1 }

</bundles_post_ra>
